<compile_context>
chip_gen: v5e
topology: v5e:2x2
jax: 0.10.0
libtpu: 0.0.40
codegen_flags: <defaults>
</compile_context>

<pallas_src>
import functools

import jax
import jax.numpy as jnp
from jax.experimental import pallas as pl
from jax.experimental.pallas import tpu as pltpu

DROPOUT_RATE = 0.5

# Integer-domain keep thresholds: keep iff bits >= T, P(keep) = 1 - T / 2^32.
_KEEP1 = 1.0 - DROPOUT_RATE            # 0.5   (dropout on x)
_KEEP2 = (1.0 - DROPOUT_RATE) ** 2     # 0.25  (two fused dropouts on h)
_THRESH1 = int((1.0 - _KEEP1) * (1 << 32))   # 0x80000000
_THRESH2 = int((1.0 - _KEEP2) * (1 << 32))   # 0xC0000000
_SCALE1 = 1.0 / _KEEP1                 # 2.0
_SCALE2 = 1.0 / _KEEP2                 # 4.0


def mlp_dropout_kernel(x_ref, m1_ref, m2_ref, w1_ref, b1_ref, w2_ref, b2_ref,
                       w3_ref, b3_ref, o_ref):
    # F.dropout(x): integer-domain keep test, inverted scaling (bf16).
    keep1 = m1_ref[...] >= jnp.uint32(_THRESH1)
    x = jnp.where(keep1, x_ref[...] * _SCALE1, 0.0)

    # input_layer (bf16 x bf16 -> f32 accumulate on the MXU)
    h = jnp.dot(x, w1_ref[...], preferred_element_type=jnp.float32) + b1_ref[...]

    # hidden_layers: ReLU -> Linear
    h = jnp.maximum(h, 0.0)
    h = jnp.dot(h.astype(jnp.bfloat16), w2_ref[...],
                preferred_element_type=jnp.float32) + b2_ref[...]

    # hidden_layers Dropout(0.5) followed by explicit F.dropout(0.5), fused
    # into a single Bernoulli(keep=0.25) dropout with 4x scale.
    keep2 = m2_ref[...] >= jnp.uint32(_THRESH2)
    h = jnp.where(keep2, h * _SCALE2, 0.0)

    # output_layer
    o_ref[...] = (jnp.dot(h.astype(jnp.bfloat16), w3_ref[...],
                          preferred_element_type=jnp.float32) + b3_ref[...])


def _round_up(v, m):
    return ((v + m - 1) // m) * m


@jax.jit
def mlp_dropout_forward(key, x, w1, b1, w2, b2, w3, b3):
    batch, embed = x.shape
    hidden = w1.shape[1]
    class_size = w3.shape[1]

    # Pad K (embedding dim) and the output feature dim up to lane multiples so
    # MXU tiles and stores are unmasked; padded columns are zero so results
    # are unchanged.
    k_pad = _round_up(embed, 128)
    n_pad = _round_up(class_size, 128)

    x_p = jnp.pad(x, ((0, 0), (0, k_pad - embed))).astype(jnp.bfloat16)
    w1_p = jnp.pad(w1, ((0, k_pad - embed), (0, 0))).astype(jnp.bfloat16)
    w2_b = w2.astype(jnp.bfloat16)
    w3_p = jnp.pad(w3, ((0, 0), (0, n_pad - class_size))).astype(jnp.bfloat16)
    b3_p = jnp.pad(b3, ((0, 0), (0, n_pad - class_size)))

    # Random bits for the dropout masks (generated on host/XLA side; the
    # kernel only does the compare + select).
    k1, k2 = jax.random.split(key)
    m1 = jax.random.bits(k1, (batch, k_pad), dtype=jnp.uint32)
    m2 = jax.random.bits(k2, (batch, hidden), dtype=jnp.uint32)

    vmem = pl.BlockSpec(memory_space=pltpu.MemorySpace.VMEM)

    out_padded = pl.pallas_call(
        mlp_dropout_kernel,
        out_shape=jax.ShapeDtypeStruct((batch, n_pad), jnp.float32),
        in_specs=[vmem] * 9,
        out_specs=vmem,
    )(x_p, m1, m2, w1_p, b1, w2_b, b2, w3_p, b3_p)

    return out_padded[:, :class_size]


def init_params(key, embedding_dim, hidden_dim, class_size):
    """Deterministic Linear-style init: U(-1/sqrt(fan_in), 1/sqrt(fan_in))."""
    ks = jax.random.split(key, 6)

    def linear(kw, kb, fan_in, fan_out):
        bound = 1.0 / (fan_in ** 0.5)
        w = jax.random.uniform(kw, (fan_in, fan_out), jnp.float32, -bound, bound)
        b = jax.random.uniform(kb, (1, fan_out), jnp.float32, -bound, bound)
        return w, b

    w1, b1 = linear(ks[0], ks[1], embedding_dim, hidden_dim)
    w2, b2 = linear(ks[2], ks[3], hidden_dim, hidden_dim)
    w3, b3 = linear(ks[4], ks[5], hidden_dim, class_size)
    return w1, b1, w2, b2, w3, b3


if __name__ == "__main__":
    embedding_dim = 300
    hidden_dim = 512
    class_size = 48
    batch = 8

    key = jax.random.PRNGKey(0)
    k_x, k_p, k_drop = jax.random.split(key, 3)

    x = jax.random.normal(k_x, (batch, embedding_dim), dtype=jnp.float32)
    w1, b1, w2, b2, w3, b3 = init_params(k_p, embedding_dim, hidden_dim, class_size)

    out = mlp_dropout_forward(k_drop, x, w1, b1, w2, b2, w3, b3)
    jax.block_until_ready(out)

    assert out.shape == (batch, class_size), out.shape
    assert out.dtype == jnp.float32
    assert bool(jnp.all(jnp.isfinite(out)))
    print("KERNEL_OK")
</pallas_src>

<mosaic_0001>
module attributes {stable_mosaic.version = 11 : i64} {
  func.func @mlp_dropout_kernel(%arg0: memref<8x384xbf16, #tpu.memory_space<vmem>>, %arg1: memref<8x384xi32, #tpu.memory_space<vmem>>, %arg2: memref<8x512xi32, #tpu.memory_space<vmem>>, %arg3: memref<384x512xbf16, #tpu.memory_space<vmem>>, %arg4: memref<1x512xf32, #tpu.memory_space<vmem>>, %arg5: memref<512x512xbf16, #tpu.memory_space<vmem>>, %arg6: memref<1x512xf32, #tpu.memory_space<vmem>>, %arg7: memref<512x128xbf16, #tpu.memory_space<vmem>>, %arg8: memref<1x128xf32, #tpu.memory_space<vmem>>, %arg9: memref<8x128xf32, #tpu.memory_space<vmem>>) attributes {dimension_semantics = [], scalar_prefetch = 0 : i64, scratch_operands = 0 : i64, tpu.core_type = #tpu.core_type<tc>} {
    %c0 = arith.constant 0 : index
    %c0_0 = arith.constant 0 : index
    %0 = vector.load %arg1[%c0, %c0_0] : memref<8x384xi32, #tpu.memory_space<vmem>>, vector<8x384xi32>
    %c-2147483648_i32 = arith.constant -2147483648 : i32
    %1 = vector.broadcast %c-2147483648_i32 : i32 to vector<8x384xi32>
    %2 = arith.cmpi uge, %0, %1 : vector<8x384xi32>
    %c0_1 = arith.constant 0 : index
    %c0_2 = arith.constant 0 : index
    %3 = vector.load %arg0[%c0_1, %c0_2] : memref<8x384xbf16, #tpu.memory_space<vmem>>, vector<8x384xbf16>
    %cst = arith.constant 2.000000e+00 : bf16
    %4 = vector.broadcast %cst : bf16 to vector<8x384xbf16>
    %5 = arith.mulf %3, %4 : vector<8x384xbf16>
    %cst_3 = arith.constant 0.000000e+00 : f32
    %6 = arith.truncf %cst_3 : f32 to bf16
    %7 = vector.broadcast %6 : bf16 to vector<8x384xbf16>
    %8 = arith.select %2, %5, %7 : vector<8x384xi1>, vector<8x384xbf16>
    %c0_4 = arith.constant 0 : index
    %c0_5 = arith.constant 0 : index
    %9 = vector.load %arg3[%c0_4, %c0_5] : memref<384x512xbf16, #tpu.memory_space<vmem>>, vector<384x512xbf16>
    %cst_6 = arith.constant dense<0.000000e+00> : vector<8x512xf32>
    %10 = tpu.matmul %8, %9, %cst_6 {dimension_numbers = #tpu.dot_dimension_numbers<[1], [0], [0], [1], [0, 0, 1, 1], [], []>} : vector<8x384xbf16>, vector<384x512xbf16>, vector<8x512xf32> -> vector<8x512xf32>
    %c0_7 = arith.constant 0 : index
    %c0_8 = arith.constant 0 : index
    %11 = vector.load %arg4[%c0_7, %c0_8] : memref<1x512xf32, #tpu.memory_space<vmem>>, vector<1x512xf32>
    %12 = vector.broadcast %11 : vector<1x512xf32> to vector<8x512xf32>
    %13 = arith.addf %10, %12 : vector<8x512xf32>
    %cst_9 = arith.constant 0.000000e+00 : f32
    %14 = vector.broadcast %cst_9 : f32 to vector<8x512xf32>
    %15 = arith.maximumf %13, %14 : vector<8x512xf32>
    %16 = arith.truncf %15 : vector<8x512xf32> to vector<8x512xbf16>
    %c0_10 = arith.constant 0 : index
    %c0_11 = arith.constant 0 : index
    %17 = vector.load %arg5[%c0_10, %c0_11] : memref<512x512xbf16, #tpu.memory_space<vmem>>, vector<512x512xbf16>
    %cst_12 = arith.constant dense<0.000000e+00> : vector<8x512xf32>
    %18 = tpu.matmul %16, %17, %cst_12 {dimension_numbers = #tpu.dot_dimension_numbers<[1], [0], [0], [1], [0, 0, 1, 1], [], []>} : vector<8x512xbf16>, vector<512x512xbf16>, vector<8x512xf32> -> vector<8x512xf32>
    %c0_13 = arith.constant 0 : index
    %c0_14 = arith.constant 0 : index
    %19 = vector.load %arg6[%c0_13, %c0_14] : memref<1x512xf32, #tpu.memory_space<vmem>>, vector<1x512xf32>
    %20 = vector.broadcast %19 : vector<1x512xf32> to vector<8x512xf32>
    %21 = arith.addf %18, %20 : vector<8x512xf32>
    %c0_15 = arith.constant 0 : index
    %c0_16 = arith.constant 0 : index
    %22 = vector.load %arg2[%c0_15, %c0_16] : memref<8x512xi32, #tpu.memory_space<vmem>>, vector<8x512xi32>
    %c-1073741824_i32 = arith.constant -1073741824 : i32
    %23 = vector.broadcast %c-1073741824_i32 : i32 to vector<8x512xi32>
    %24 = arith.cmpi uge, %22, %23 : vector<8x512xi32>
    %cst_17 = arith.constant 4.000000e+00 : f32
    %25 = vector.broadcast %cst_17 : f32 to vector<8x512xf32>
    %26 = arith.mulf %21, %25 : vector<8x512xf32>
    %cst_18 = arith.constant 0.000000e+00 : f32
    %27 = vector.broadcast %cst_18 : f32 to vector<8x512xf32>
    %28 = arith.select %24, %26, %27 : vector<8x512xi1>, vector<8x512xf32>
    %29 = arith.truncf %28 : vector<8x512xf32> to vector<8x512xbf16>
    %c0_19 = arith.constant 0 : index
    %c0_20 = arith.constant 0 : index
    %30 = vector.load %arg7[%c0_19, %c0_20] : memref<512x128xbf16, #tpu.memory_space<vmem>>, vector<512x128xbf16>
    %cst_21 = arith.constant dense<0.000000e+00> : vector<8x128xf32>
    %31 = tpu.matmul %29, %30, %cst_21 {dimension_numbers = #tpu.dot_dimension_numbers<[1], [0], [0], [1], [0, 0, 1, 1], [], []>} : vector<8x512xbf16>, vector<512x128xbf16>, vector<8x128xf32> -> vector<8x128xf32>
    %c0_22 = arith.constant 0 : index
    %c0_23 = arith.constant 0 : index
    %32 = vector.load %arg8[%c0_22, %c0_23] : memref<1x128xf32, #tpu.memory_space<vmem>>, vector<1x128xf32>
    %33 = vector.broadcast %32 : vector<1x128xf32> to vector<8x128xf32>
    %34 = arith.addf %31, %33 : vector<8x128xf32>
    %c0_24 = arith.constant 0 : index
    %c0_25 = arith.constant 0 : index
    %35 = vector.load %arg9[%c0_24, %c0_25] : memref<8x128xf32, #tpu.memory_space<vmem>>, vector<8x128xf32>
    tpu.vector_store %arg9[%c0_24, %c0_25], %34 {strides = array<i32>} : memref<8x128xf32, #tpu.memory_space<vmem>>, vector<8x128xf32>,
    return
  }
}

</mosaic_0001>

<bundles_post_ra>
// kernel: mlp_dropout_forward.3
= control target key start
LH: loop header
LB: loop body
LE: loop exit
PB: predicated region body
PF: predicated region fallthrough
CT: control target
= control target key end

     0   :  { %s5116_s0 = inlined_call_operand.vmem [shape: bf16[8,384], index: 0, kind: input, shape index: {}]   ;;  %s5117_s1 = inlined_call_operand.vmem [shape: u32[8,384], index: 1, kind: input, shape index: {}]   ;;  %s5118_s2 = inlined_call_operand.vmem [shape: u32[8,512], index: 2, kind: input, shape index: {}]   ;;  %s5119_s3 = inlined_call_operand.vmem [shape: bf16[384,512], index: 3, kind: input, shape index: {}]   ;;  %s5120_s4 = inlined_call_operand.vmem [shape: f32[1,512], index: 4, kind: input, shape index: {}]   ;;  %s5121_s5 = inlined_call_operand.vmem [shape: bf16[512,512], index: 5, kind: input, shape index: {}]   ;;  %s5122_s6 = inlined_call_operand.vmem [shape: f32[1,512], index: 6, kind: input, shape index: {}]   ;;  %s5123_s7 = inlined_call_operand.vmem [shape: bf16[512,128], index: 7, kind: input, shape index: {}]   ;;  %s5124_s8 = inlined_call_operand.vmem [shape: f32[1,128], index: 8, kind: input, shape index: {}]   ;;  %s5125_s9 = inlined_call_operand.hbm [shape: f32[8,128], index: 9, kind: output, shape index: {}]  }
   0x1   :  { %v2281_v0 = vld [vmem:[%s5119_s3 + $0xe0] sm:$0xf]  ;;  %v3237_v1 = vld [vmem:[%s5119_s3 + $0xec] sm:$0xf0]  ;;  %v3235_v9 = vld [vmem:[%s5119_s3 + $0xe4] sm:$0xf] }
   0x2   :  { %v2409_v2 = vld [vmem:[%s5119_s3 + $0x1e0] sm:$0xf]  ;;  %v2282_v3 = vor.u32 %v3237_v1, %v2281_v0  ;;  %v3269_v4 = vld [vmem:[%s5119_s3 + $0x1ec] sm:$0xf0]  ;;  %v2283_v10 = vld [vmem:[%s5119_s3 + $0xf0] sm:$0xf0] }
   0x3   :  { %v2537_v5 = vld [vmem:[%s5119_s3 + $0x2e0] sm:$0xf]  ;;  %v3301_v6 = vld [vmem:[%s5119_s3 + $0x2ec] sm:$0xf0]  ;;  %v2410_v7 = vor.u32 %v3269_v4, %v2409_v2  ;;  %v2286_v12 = vor.u32 %v3235_v9, %v2283_v10  ;;  %v3231_v20 = vld [vmem:[%s5119_s3 + $0xc4] sm:$0xf] }
   0x4   :  { %v2538_v8 = vor.u32 %v3301_v6, %v2537_v5  ;;  %v2265_v11 = vld [vmem:[%s5119_s3 + $0xc0] sm:$0xf]  ;;  %657 = vmatpush.bf16.msra.mxu0 %v2282_v3  ;;  %v3233_v13 = vld [vmem:[%s5119_s3 + $0xcc] sm:$0xf0]  ;;  %v2267_v22 = vld [vmem:[%s5119_s3 + $0xd0] sm:$0xf0] }
   0x5   :  { %v2393_v14 = vld [vmem:[%s5119_s3 + $0x1c0] sm:$0xf]  ;;  %v3265_v15 = vld [vmem:[%s5119_s3 + $0x1cc] sm:$0xf0]  ;;  %670 = vmatpush.bf16.msra.mxu1 %v2410_v7  ;;  %v2266_v16 = vor.u32 %v3233_v13, %v2265_v11  ;;  %696 = vmatpush.bf16.msra.mxu3 %v2286_v12  ;;  %v2270_v25 = vor.u32 %v3231_v20, %v2267_v22  ;;  %v3227_v31 = vld [vmem:[%s5119_s3 + $0xa4] sm:$0xf] }
   0x6   :  { %683 = vmatpush.bf16.msra.mxu2 %v2538_v8  ;;  %v2394_v17 = vor.u32 %v3265_v15, %v2393_v14  ;;  %v2521_v18 = vld [vmem:[%s5119_s3 + $0x2c0] sm:$0xf]  ;;  %v3297_v19 = vld [vmem:[%s5119_s3 + $0x2cc] sm:$0xf0]  ;;  %v2251_v32 = vld [vmem:[%s5119_s3 + $0xb0] sm:$0xf0] }
   0x7   :  { %v2522_v21 = vor.u32 %v3297_v19, %v2521_v18  ;;  %v2249_v23 = vld [vmem:[%s5119_s3 + $0xa0] sm:$0xf]  ;;  %v3229_v24 = vld [vmem:[%s5119_s3 + $0xac] sm:$0xf0]  ;;  %v2254_v38 = vor.u32 %v3227_v31, %v2251_v32  ;;  %v3223_v42 = vld [vmem:[%s5119_s3 + $0x84] sm:$0xf] }
   0x8   :  { %v2377_v26 = vld [vmem:[%s5119_s3 + $0x1a0] sm:$0xf]  ;;  %v3261_v27 = vld [vmem:[%s5119_s3 + $0x1ac] sm:$0xf0]  ;;  %658 = vmatpush.bf16.msra.mxu0 %v2266_v16  ;;  %v2250_v29 = vor.u32 %v3229_v24, %v2249_v23  ;;  %v2235_v43 = vld [vmem:[%s5119_s3 + $0x90] sm:$0xf0] }
   0x9   :  { %v2505_v28 = vld [vmem:[%s5119_s3 + $0x2a0] sm:$0xf]  ;;  %v3293_v30 = vld [vmem:[%s5119_s3 + $0x2ac] sm:$0xf0]  ;;  %671 = vmatpush.bf16.msra.mxu1 %v2394_v17  ;;  %v2378_v33 = vor.u32 %v3261_v27, %v2377_v26  ;;  %697 = vmatpush.bf16.msra.mxu3 %v2270_v25  ;;  %v2238_v50 = vor.u32 %v3223_v42, %v2235_v43  ;;  %v3219_v54 = vld [vmem:[%s5119_s3 + $0x64] sm:$0xf] }
   0xa   :  { %684 = vmatpush.bf16.msra.mxu2 %v2522_v21  ;;  %v2506_v34 = vor.u32 %v3293_v30, %v2505_v28  ;;  %v2233_v35 = vld [vmem:[%s5119_s3 + $0x80] sm:$0xf]  ;;  %v3225_v36 = vld [vmem:[%s5119_s3 + $0x8c] sm:$0xf0]  ;;  %v2219_v55 = vld [vmem:[%s5119_s3 + $0x70] sm:$0xf0] }
   0xb   :  { %v2361_v37 = vld [vmem:[%s5119_s3 + $0x180] sm:$0xf]  ;;  %v3257_v39 = vld [vmem:[%s5119_s3 + $0x18c] sm:$0xf0]  ;;  %v2234_v44 = vor.u32 %v3225_v36, %v2233_v35  ;;  %v2222_v62 = vor.u32 %v3219_v54, %v2219_v55  ;;  %v3215_v2 = vld [vmem:[%s5119_s3 + $0x44] sm:$0xf] }
   0xc   :  { %v2489_v40 = vld [vmem:[%s5119_s3 + $0x280] sm:$0xf]  ;;  %v3289_v41 = vld [vmem:[%s5119_s3 + $0x28c] sm:$0xf0]  ;;  %659 = vmatpush.bf16.msra.mxu0 %v2250_v29  ;;  %v2362_v45 = vor.u32 %v3257_v39, %v2361_v37  ;;  %v2203_v3 = vld [vmem:[%s5119_s3 + $0x50] sm:$0xf0] }
   0xd   :  { %672 = vmatpush.bf16.msra.mxu1 %v2378_v33  ;;  %v2490_v46 = vor.u32 %v3289_v41, %v2489_v40  ;;  %v2217_v47 = vld [vmem:[%s5119_s3 + $0x60] sm:$0xf]  ;;  %v3221_v48 = vld [vmem:[%s5119_s3 + $0x6c] sm:$0xf0]  ;;  %698 = vmatpush.bf16.msra.mxu3 %v2254_v38  ;;  %v2206_v12 = vor.u32 %v3215_v2, %v2203_v3  ;;  %v3211_v14 = vld [vmem:[%s5119_s3 + $0x24] sm:$0xf] }
   0xe   :  { %685 = vmatpush.bf16.msra.mxu2 %v2506_v34  ;;  %v2345_v49 = vld [vmem:[%s5119_s3 + $0x160] sm:$0xf]  ;;  %v3253_v51 = vld [vmem:[%s5119_s3 + $0x16c] sm:$0xf0]  ;;  %v2218_v56 = vor.u32 %v3221_v48, %v2217_v47  ;;  %v2187_v15 = vld [vmem:[%s5119_s3 + $0x30] sm:$0xf0] }
   0xf   :  { %v2473_v52 = vld [vmem:[%s5119_s3 + $0x260] sm:$0xf]  ;;  %v3285_v53 = vld [vmem:[%s5119_s3 + $0x26c] sm:$0xf0]  ;;  %v2346_v57 = vor.u32 %v3253_v51, %v2345_v49  ;;  %v3207_v25 = vld [vmem:[%s5119_s3 + $0x4] sm:$0xf]  ;;  %v2190_v32 = vor.u32 %v3211_v14, %v2187_v15 }
  0x10   :  { %660 = vmatpush.bf16.msra.mxu0 %v2234_v44  ;;  %v2474_v58 = vor.u32 %v3285_v53, %v2473_v52  ;;  %v2201_v59 = vld [vmem:[%s5119_s3 + $0x40] sm:$0xf]  ;;  %v3217_v60 = vld [vmem:[%s5119_s3 + $0x4c] sm:$0xf0]  ;;  %v2171_v26 = vld [vmem:[%s5119_s3 + $0x10] sm:$0xf0] }
  0x11   :  { %673 = vmatpush.bf16.msra.mxu1 %v2362_v45  ;;  %v2329_v61 = vld [vmem:[%s5119_s3 + $0x140] sm:$0xf]  ;;  %699 = vmatpush.bf16.msra.mxu3 %v2238_v50  ;;  %v3249_v63 = vld [vmem:[%s5119_s3 + $0x14c] sm:$0xf0]  ;;  %v2202_v4 = vor.u32 %v3217_v60, %v2201_v59  ;;  %v3267_v27 = vld [vmem:[%s5119_s3 + $0x1e4] sm:$0xf] }
  0x12   :  { %686 = vmatpush.bf16.msra.mxu2 %v2490_v46  ;;  %v2457_v0 = vld [vmem:[%s5119_s3 + $0x240] sm:$0xf]  ;;  %v3281_v1 = vld [vmem:[%s5119_s3 + $0x24c] sm:$0xf0]  ;;  %v2330_v7 = vor.u32 %v3249_v63, %v2329_v61  ;;  %v2411_v28 = vld [vmem:[%s5119_s3 + $0x1f0] sm:$0xf0] }
  0x13   :  { %v2185_v5 = vld [vmem:[%s5119_s3 + $0x20] sm:$0xf]  ;;  %v3213_v6 = vld [vmem:[%s5119_s3 + $0x2c] sm:$0xf0]  ;;  %v2458_v8 = vor.u32 %v3281_v1, %v2457_v0  ;;  %v47_v30 = vld [vmem:[%s5116_s0 + $0x8] sm:$0xf] }
  0x14   :  { %661 = vmatpush.bf16.msra.mxu0 %v2218_v56  ;;  %v2313_v9 = vld [vmem:[%s5119_s3 + $0x120] sm:$0xf]  ;;  %v3245_v10 = vld [vmem:[%s5119_s3 + $0x12c] sm:$0xf0]  ;;  %v2186_v19 = vor.u32 %v3213_v6, %v2185_v5  ;;  %v3299_v33 = vld [vmem:[%s5119_s3 + $0x2e4] sm:$0xf]  ;;  %v50_v36 = vunpack.c.l.bf16 %v47_v30  ;;  %v2174_v56 = vor.u32 %v3207_v25, %v2171_v26 }
  0x15   :  { %674 = vmatpush.bf16.msra.mxu1 %v2346_v57  ;;  %v2441_v11 = vld [vmem:[%s5119_s3 + $0x220] sm:$0xf]  ;;  %700 = vmatpush.bf16.msra.mxu3 %v2222_v62  ;;  %v3277_v13 = vld [vmem:[%s5119_s3 + $0x22c] sm:$0xf0]  ;;  %v2314_v23 = vor.u32 %v3245_v10, %v2313_v9  ;;  %v2539_v34 = vld [vmem:[%s5119_s3 + $0x2f0] sm:$0xf0]  ;;  %v2414_v57 = vor.u32 %v3267_v27, %v2411_v28 }
  0x16   :  { %687 = vmatpush.bf16.msra.mxu2 %v2474_v58  ;;  %v2169_v16 = vld [vmem:[%s5119_s3] sm:$0xf]  ;;  %v3209_v17 = vld [vmem:[%s5119_s3 + $0xc] sm:$0xf0]  ;;  %v2442_v24 = vor.u32 %v3277_v13, %v2441_v11  ;;  %v35_v37 = vld [vmem:[%s5117_s1 + $0x8] sm:$0xff]  ;;  %v53_v49 = vmul.f32 2.0, %v50_v36  ;;  %v2542_v60 = vor.u32 %v3299_v33, %v2539_v34 }
  0x17   :  { %v3719_v18 = vld [vmem:[%s5119_s3 + $0x100] sm:$0xf]  ;;  %v3241_v20 = vld [vmem:[%s5119_s3 + $0x10c] sm:$0xf0]  ;;  %v2170_v40 = vor.u32 %v3209_v17, %v2169_v16  ;;  %v2289_v41 = vld [vmem:[%s5119_s3 + $0xe8] sm:$0xf] }
  0x18   :  { %662 = vmatpush.bf16.msra.mxu0 %v2202_v4  ;;  %v2425_v21 = vld [vmem:[%s5119_s3 + $0x200] sm:$0xf]  ;;  %v3273_v22 = vld [vmem:[%s5119_s3 + $0x20c] sm:$0xf0]  ;;  %v3238_v42 = vld [vmem:[%s5119_s3 + $0xf4] sm:$0xf0]  ;;  %v2298_v46 = vor.u32 %v3241_v20, %v3719_v18  ;;  %v55_v58 = vpack.c.bf16 %v53_v49, %v53_v49 }
  0x19   :  { %675 = vmatpush.bf16.msra.mxu1 %v2330_v7  ;;  %v36_v29 = vld [vmem:[%s5117_s1 + $0x10] sm:$0xff]  ;;  %v34_v31 = vld [vmem:[%s5117_s1] sm:$0xff]  ;;  %701 = vmatpush.bf16.msra.mxu3 %v2206_v12  ;;  %v2165_v43 = vxor.u32 2147483648, %v35_v37  ;;  %v2417_v47 = vld [vmem:[%s5119_s3 + $0x1e8] sm:$0xf]  ;;  %v2426_v51 = vor.u32 %v3273_v22, %v2425_v21  ;;  %v2290_v61 = vor.u32 %v3238_v42, %v2289_v41 }
  0x1a   :  { %688 = vmatpush.bf16.msra.mxu2 %v2458_v8  ;;  %v2166_v35 = vxor.u32 2147483648, %v36_v29  ;;  %v2164_v38 = vxor.u32 2147483648, %v34_v31  ;;  %v46_v39 = vld [vmem:[%s5116_s0] sm:$0xff]  ;;  %v3270_v52 = vld [vmem:[%s5119_s3 + $0x1f4] sm:$0xf0] }
  0x1b   :  { %v48_v44 = vunpack.c.l.bf16 %v46_v39  ;;  %v49_v45 = vunpack.c.h.bf16 %v46_v39  ;;  %vm3787_vm3 = vcmp.ge.s32.totalorder %v2165_v43, 0  ;;  %v3263_v59 = vld [vmem:[%s5119_s3 + $0x1c4] sm:$0xf]  ;;  %v2395_v63 = vld [vmem:[%s5119_s3 + $0x1d0] sm:$0xf0]  ;;  %v2418_v2 = vor.u32 %v3270_v52, %v2417_v47 }
  0x1c   :  { %663 = vmatpush.bf16.msra.mxu0 %v2186_v19  ;;  %vm3773_vm0 = vcmp.ge.s32.totalorder %v2166_v35, 0  ;;  %vm3777_vm1 = vcmp.ge.s32.totalorder %v2164_v38, 0  ;;  %v3295_v0 = vld [vmem:[%s5119_s3 + $0x2c4] sm:$0xf]  ;;  %v2523_v1 = vld [vmem:[%s5119_s3 + $0x2d0] sm:$0xf0]  ;;  %v2398_v13 = vor.u32 %v3263_v59, %v2395_v63 }
  0x1d   :  { %676 = vmatpush.bf16.msra.mxu1 %v2314_v23  ;;  %vm57_vm2 = vmpackc.low %vm3773_vm0, %vm3773_vm0  ;;  %v51_v54 = vmul.f32 2.0, %v48_v44  ;;  %v52_v55 = vmul.f32 2.0, %v49_v45  ;;  %702 = vmatpush.bf16.msra.mxu3 %v2190_v32  ;;  %v2273_v4 = vld [vmem:[%s5119_s3 + $0xc8] sm:$0xf]  ;;  %v3234_v5 = vld [vmem:[%s5119_s3 + $0xd4] sm:$0xf0]  ;;  %v2526_v14 = vor.u32 %v3295_v0, %v2523_v1 }
  0x1e   :  { %689 = vmatpush.bf16.msra.mxu2 %v2442_v24  ;;  %vm56_vm4 = vmpackc.low %vm3787_vm3, %vm3777_vm1  ;;  %v59_v3 = vsel %vm57_vm2, %v55_v58, 0  ;;  %v2401_v8 = vld [vmem:[%s5119_s3 + $0x1c8] sm:$0xf]  ;;  %v3266_v9 = vld [vmem:[%s5119_s3 + $0x1d4] sm:$0xf0]  ;;  %v2274_v18 = vor.u32 %v3234_v5, %v2273_v4 }
  0x1f   :  { %v54_v62 = vpack.c.bf16 %v52_v55, %v51_v54  ;;  %v170_v6 = vunpack.c.l.b16 %v59_v3  ;;  %v3259_v15 = vld [vmem:[%s5119_s3 + $0x1a4] sm:$0xf]  ;;  %v2379_v16 = vld [vmem:[%s5119_s3 + $0x1b0] sm:$0xf0]  ;;  %v2402_v19 = vor.u32 %v3266_v9, %v2401_v8  ;;  %v2257_v23 = vld [vmem:[%s5119_s3 + $0xa8] sm:$0xf] }
  0x20   :  { %664 = vmatpush.bf16.msra.mxu0 %v2170_v40  ;;  %v3291_v21 = vld [vmem:[%s5119_s3 + $0x2a4] sm:$0xf]  ;;  %v2507_v22 = vld [vmem:[%s5119_s3 + $0x2b0] sm:$0xf0]  ;;  %v3230_v24 = vld [vmem:[%s5119_s3 + $0xb4] sm:$0xf0]  ;;  %v2382_v27 = vor.u32 %v3259_v15, %v2379_v16 }
  0x21   :  { %677 = vmatpush.bf16.msra.mxu1 %v2298_v46  ;;  %v58_v7 = vsel %vm56_vm4, %v54_v62, 0  ;;  %703 = vmatpush.bf16.msra.mxu3 %v2174_v56  ;;  %v3829_v12 = vpack.c.b16 %v170_v6, %v170_v6  ;;  %v2385_v25 = vld [vmem:[%s5119_s3 + $0x1a8] sm:$0xf]  ;;  %v3262_v26 = vld [vmem:[%s5119_s3 + $0x1b4] sm:$0xf0]  ;;  %v2510_v28 = vor.u32 %v3291_v21, %v2507_v22  ;;  %v2258_v31 = vor.u32 %v3230_v24, %v2257_v23 }
  0x22   :  { %690 = vmatpush.bf16.msra.mxu2 %v2426_v51  ;;  %v168_v10 = vunpack.c.l.b16 %v58_v7  ;;  %v169_v11 = vunpack.c.h.b16 %v58_v7  ;;  %v3255_v29 = vld [vmem:[%s5119_s3 + $0x184] sm:$0xf]  ;;  %v2363_v30 = vld [vmem:[%s5119_s3 + $0x190] sm:$0xf0]  ;;  %v2386_v32 = vor.u32 %v3262_v26, %v2385_v25  ;;  %v2241_v35 = vld [vmem:[%s5119_s3 + $0x88] sm:$0xf] }
  0x23   :  { %v3287_v33 = vld [vmem:[%s5119_s3 + $0x284] sm:$0xf]  ;;  %v2491_v34 = vld [vmem:[%s5119_s3 + $0x290] sm:$0xf0]  ;;  %v3226_v36 = vld [vmem:[%s5119_s3 + $0x94] sm:$0xf0]  ;;  %v2366_v39 = vor.u32 %v3255_v29, %v2363_v30 }
  0x24   :  { %709 = vmatpush.bf16.msrb.mxu0 %v2414_v57  ;;  %v3837_v17 = vpack.c.b16 %v168_v10, %v168_v10  ;;  %v3839_v20 = vpack.c.b16 %v169_v11, %v169_v11  ;;  %v2369_v37 = vld [vmem:[%s5119_s3 + $0x188] sm:$0xf]  ;;  %v3258_v38 = vld [vmem:[%s5119_s3 + $0x194] sm:$0xf0]  ;;  %v2494_v40 = vor.u32 %v3287_v33, %v2491_v34  ;;  %v3251_v41 = vld [vmem:[%s5119_s3 + $0x164] sm:$0xf]  ;;  %v2242_v43 = vor.u32 %v3226_v36, %v2241_v35 }
  0x25   :  { %722 = vmatpush.bf16.msrb.mxu1 %v2542_v60  ;;  %748 = vmatpush.bf16.msrb.mxu3 %v2418_v2  ;;  %v2347_v42 = vld [vmem:[%s5119_s3 + $0x170] sm:$0xf0]  ;;  %v2370_v44 = vor.u32 %v3258_v38, %v2369_v37  ;;  %v3283_v45 = vld [vmem:[%s5119_s3 + $0x264] sm:$0xf]  ;;  %v2225_v47 = vld [vmem:[%s5119_s3 + $0x68] sm:$0xf] }
  0x26   :  { %735 = vmatpush.bf16.msrb.mxu2 %v2290_v61  ;;  %665 = vmatmul.bf16.vlgmr.msra.gmra.mxu0 %v3837_v17  ;;  %v2475_v46 = vld [vmem:[%s5119_s3 + $0x270] sm:$0xf0]  ;;  %v3222_v48 = vld [vmem:[%s5119_s3 + $0x74] sm:$0xf0]  ;;  %v2353_v49 = vld [vmem:[%s5119_s3 + $0x168] sm:$0xf]  ;;  %v2350_v51 = vor.u32 %v3251_v41, %v2347_v42 }
  0x27   :  { %691 = vmatmul.bf16.vlgmr.msra.gmra.mxu2 %v3829_v12  ;;  %678 = vmatmul.bf16.vlgmr.msra.gmra.mxu1 %v3839_v20  ;;  %v3254_v50 = vld [vmem:[%s5119_s3 + $0x174] sm:$0xf0]  ;;  %v2478_v52 = vor.u32 %v3283_v45, %v2475_v46  ;;  %v3247_v53 = vld [vmem:[%s5119_s3 + $0x144] sm:$0xf]  ;;  %v2331_v54 = vld [vmem:[%s5119_s3 + $0x150] sm:$0xf0]  ;;  %v2226_v55 = vor.u32 %v3222_v48, %v2225_v47 }
  0x28   :  { %710 = vmatpush.bf16.msrb.mxu0 %v2398_v13  ;;  %704 = vmatmul.bf16.vlgmr.msra.gmra.mxu3 %v3837_v17  ;;  %v2354_v56 = vor.u32 %v3254_v50, %v2353_v49  ;;  %v3279_v57 = vld [vmem:[%s5119_s3 + $0x244] sm:$0xf]  ;;  %v2459_v58 = vld [vmem:[%s5119_s3 + $0x250] sm:$0xf0]  ;;  %v2209_v59 = vld [vmem:[%s5119_s3 + $0x48] sm:$0xf]  ;;  %v2334_v63 = vor.u32 %v3247_v53, %v2331_v54 }
  0x29   :  { %723 = vmatpush.bf16.msrb.mxu1 %v2526_v14  ;;  %749 = vmatpush.bf16.msrb.mxu3 %v2402_v19  ;;  %v3218_v60 = vld [vmem:[%s5119_s3 + $0x54] sm:$0xf0]  ;;  %v2337_v61 = vld [vmem:[%s5119_s3 + $0x148] sm:$0xf]  ;;  %v2462_v0 = vor.u32 %v3279_v57, %v2459_v58  ;;  %v3243_v1 = vld [vmem:[%s5119_s3 + $0x124] sm:$0xf] }
  0x2a   :  { %736 = vmatpush.bf16.msrb.mxu2 %v2274_v18  ;;  %v3250_v62 = vld [vmem:[%s5119_s3 + $0x154] sm:$0xf0]  ;;  %v2315_v2 = vld [vmem:[%s5119_s3 + $0x130] sm:$0xf0]  ;;  %v2210_v3 = vor.u32 %v3218_v60, %v2209_v59  ;;  %v3275_v5 = vld [vmem:[%s5119_s3 + $0x224] sm:$0xf] }
  0x2b   :  { %v2338_v4 = vor.u32 %v3250_v62, %v2337_v61  ;;  %v2443_v6 = vld [vmem:[%s5119_s3 + $0x230] sm:$0xf0]  ;;  %v2193_v7 = vld [vmem:[%s5119_s3 + $0x28] sm:$0xf]  ;;  %v3214_v8 = vld [vmem:[%s5119_s3 + $0x34] sm:$0xf0]  ;;  %v2318_v13 = vor.u32 %v3243_v1, %v2315_v2 }
  0x2c   :  { %711 = vmatpush.bf16.msrb.mxu0 %v2382_v27  ;;  %v2321_v9 = vld [vmem:[%s5119_s3 + $0x128] sm:$0xf]  ;;  %v3246_v10 = vld [vmem:[%s5119_s3 + $0x134] sm:$0xf0]  ;;  %v3239_v11 = vld [vmem:[%s5119_s3 + $0x104] sm:$0xf]  ;;  %v2446_v14 = vor.u32 %v3275_v5, %v2443_v6  ;;  %v2194_v19 = vor.u32 %v3214_v8, %v2193_v7 }
  0x2d   :  { %724 = vmatpush.bf16.msrb.mxu1 %v2510_v28  ;;  %750 = vmatpush.bf16.msrb.mxu3 %v2386_v32  ;;  %v2299_v15 = vld [vmem:[%s5119_s3 + $0x110] sm:$0xf0]  ;;  %v3271_v16 = vld [vmem:[%s5119_s3 + $0x204] sm:$0xf]  ;;  %v2322_v21 = vor.u32 %v3246_v10, %v2321_v9  ;;  %v2177_v22 = vld [vmem:[%s5119_s3 + $0x8] sm:$0xf] }
  0x2e   :  { %737 = vmatpush.bf16.msrb.mxu2 %v2258_v31  ;;  %v2427_v18 = vld [vmem:[%s5119_s3 + $0x210] sm:$0xf0]  ;;  %v3210_v23 = vld [vmem:[%s5119_s3 + $0x14] sm:$0xf0]  ;;  %v2305_v24 = vld [vmem:[%s5119_s3 + $0x108] sm:$0xf]  ;;  %v2302_v31 = vor.u32 %v3239_v11, %v2299_v15 }
  0x2f   :  { %v3242_v25 = vld [vmem:[%s5119_s3 + $0x114] sm:$0xf0]  ;;  %v2545_v26 = vld [vmem:[%s5119_s3 + $0x2e8] sm:$0xf]  ;;  %v3236_v28 = vld [vmem:[%s5119_s3 + $0xec] sm:$0xf]  ;;  %v2430_v32 = vor.u32 %v3271_v16, %v2427_v18  ;;  %v2178_v36 = vor.u32 %v3210_v23, %v2177_v22 }
  0x30   :  { %712 = vmatpush.bf16.msrb.mxu0 %v2366_v39  ;;  %v3302_v27 = vld [vmem:[%s5119_s3 + $0x2f4] sm:$0xf0]  ;;  %v2291_v29 = vld [vmem:[%s5119_s3 + $0xf8] sm:$0xf0]  ;;  %v3268_v30 = vld [vmem:[%s5119_s3 + $0x1ec] sm:$0xf]  ;;  %v2306_v37 = vor.u32 %v3242_v25, %v2305_v24 }
  0x31   :  { %725 = vmatpush.bf16.msrb.mxu1 %v2494_v40  ;;  %751 = vmatpush.bf16.msrb.mxu3 %v2370_v44  ;;  %v2419_v33 = vld [vmem:[%s5119_s3 + $0x1f8] sm:$0xf0]  ;;  %v3300_v34 = vld [vmem:[%s5119_s3 + $0x2ec] sm:$0xf]  ;;  %v2546_v38 = vor.u32 %v3302_v27, %v2545_v26  ;;  %v2294_v39 = vor.u32 %v3236_v28, %v2291_v29  ;;  %v2529_v40 = vld [vmem:[%s5119_s3 + $0x2c8] sm:$0xf] }
  0x32   :  { %738 = vmatpush.bf16.msrb.mxu2 %v2242_v43  ;;  %v2547_v35 = vld [vmem:[%s5119_s3 + $0x2f8] sm:$0xf0]  ;;  %v3298_v41 = vld [vmem:[%s5119_s3 + $0x2d4] sm:$0xf0]  ;;  %v2422_v42 = vor.u32 %v3268_v30, %v2419_v33  ;;  %v3232_v44 = vld [vmem:[%s5119_s3 + $0xcc] sm:$0xf] }
  0x33   :  { %v2550_v43 = vor.u32 %v3300_v34, %v2547_v35  ;;  %v2275_v45 = vld [vmem:[%s5119_s3 + $0xd8] sm:$0xf0]  ;;  %v3264_v46 = vld [vmem:[%s5119_s3 + $0x1cc] sm:$0xf]  ;;  %v2530_v50 = vor.u32 %v3298_v41, %v2529_v40  ;;  %v3294_v53 = vld [vmem:[%s5119_s3 + $0x2b4] sm:$0xf0] }
  0x34   :  { %713 = vmatpush.bf16.msrb.mxu0 %v2350_v51  ;;  %v2403_v47 = vld [vmem:[%s5119_s3 + $0x1d8] sm:$0xf0]  ;;  %v3296_v48 = vld [vmem:[%s5119_s3 + $0x2cc] sm:$0xf]  ;;  %v2278_v51 = vor.u32 %v3232_v44, %v2275_v45  ;;  %v3290_v1 = vld [vmem:[%s5119_s3 + $0x294] sm:$0xf0] }
  0x35   :  { %726 = vmatpush.bf16.msrb.mxu1 %v2478_v52  ;;  %752 = vmatpush.bf16.msrb.mxu3 %v2354_v56  ;;  %v2531_v49 = vld [vmem:[%s5119_s3 + $0x2d8] sm:$0xf0]  ;;  %v2513_v52 = vld [vmem:[%s5119_s3 + $0x2a8] sm:$0xf]  ;;  %v2406_v54 = vor.u32 %v3264_v46, %v2403_v47  ;;  %v3228_v56 = vld [vmem:[%s5119_s3 + $0xac] sm:$0xf] }
  0x36   :  { %739 = vmatpush.bf16.msrb.mxu2 %v2226_v55  ;;  %v2534_v55 = vor.u32 %v3296_v48, %v2531_v49  ;;  %v2259_v57 = vld [vmem:[%s5119_s3 + $0xb8] sm:$0xf0]  ;;  %v3260_v58 = vld [vmem:[%s5119_s3 + $0x1ac] sm:$0xf]  ;;  %v2514_v62 = vor.u32 %v3294_v53, %v2513_v52 }
  0x37   :  { %v2387_v59 = vld [vmem:[%s5119_s3 + $0x1b8] sm:$0xf0]  ;;  %v3292_v60 = vld [vmem:[%s5119_s3 + $0x2ac] sm:$0xf] }
  0x38   :  { %714 = vmatpush.bf16.msrb.mxu0 %v2334_v63  ;;  %v2515_v61 = vld [vmem:[%s5119_s3 + $0x2b8] sm:$0xf0]  ;;  %v2262_v63 = vor.u32 %v3228_v56, %v2259_v57  ;;  %v2390_v2 = vor.u32 %v3260_v58, %v2387_v59  ;;  %v3256_v6 = vld [vmem:[%s5119_s3 + $0x18c] sm:$0xf] }
  0x39   :  { %727 = vmatpush.bf16.msrb.mxu1 %v2462_v0  ;;  %753 = vmatpush.bf16.msrb.mxu3 %v2338_v4  ;;  %v2497_v0 = vld [vmem:[%s5119_s3 + $0x288] sm:$0xf]  ;;  %v3224_v4 = vld [vmem:[%s5119_s3 + $0x8c] sm:$0xf]  ;;  %v2243_v5 = vld [vmem:[%s5119_s3 + $0x98] sm:$0xf0] }
  0x3a   :  { %740 = vmatpush.bf16.msrb.mxu2 %v2210_v3  ;;  %v2518_v3 = vor.u32 %v3292_v60, %v2515_v61  ;;  %v2371_v7 = vld [vmem:[%s5119_s3 + $0x198] sm:$0xf0]  ;;  %v3288_v8 = vld [vmem:[%s5119_s3 + $0x28c] sm:$0xf] }
  0x3b   :  { %v2499_v9 = vld [vmem:[%s5119_s3 + $0x298] sm:$0xf0] }
  0x3c   :  { %715 = vmatpush.bf16.msrb.mxu0 %v2318_v13 }
  0x3d   :  { %728 = vmatpush.bf16.msrb.mxu1 %v2446_v14  ;;  %754 = vmatpush.bf16.msrb.mxu3 %v2322_v21 }
  0x3e   :  { %741 = vmatpush.bf16.msrb.mxu2 %v2194_v19 }
  0x40   :  { %716 = vmatpush.bf16.msrb.mxu0 %v2302_v31 }
  0x41   :  { %729 = vmatpush.bf16.msrb.mxu1 %v2430_v32  ;;  %755 = vmatpush.bf16.msrb.mxu3 %v2306_v37 }
  0x42   :  { %742 = vmatpush.bf16.msrb.mxu2 %v2178_v36 }
  0x43   :  { %717 = vmatmul.bf16.vlgmr.msrb.gmra.mxu0 %v3839_v20 }
  0x44   :  { %761 = vmatpush.bf16.msra.mxu0 %v2546_v38  ;;  %730 = vmatmul.bf16.vlgmr.msrb.gmra.mxu1 %v3829_v12 }
  0x45   :  { %774 = vmatpush.bf16.msra.mxu1 %v2294_v39  ;;  %800 = vmatpush.bf16.msra.mxu3 %v2550_v43 }
  0x46   :  { %787 = vmatpush.bf16.msra.mxu2 %v2422_v42  ;;  %756 = vmatmul.bf16.vlgmr.msrb.gmra.mxu3 %v3839_v20 }
  0x47   :  { %743 = vmatmul.bf16.vlgmr.msrb.gmra.mxu2 %v3837_v17 }
  0x48   :  { %762 = vmatpush.bf16.msra.mxu0 %v2530_v50 }
  0x49   :  { %775 = vmatpush.bf16.msra.mxu1 %v2278_v51  ;;  %801 = vmatpush.bf16.msra.mxu3 %v2534_v55 }
  0x4a   :  { %788 = vmatpush.bf16.msra.mxu2 %v2406_v54 }
  0x4b   :  { %14 = vsyncpa [#allocation3], 0  ;;  %v2498_v10 = vor.u32 %v3290_v1, %v2497_v0  ;;  %v2246_v11 = vor.u32 %v3224_v4, %v2243_v5  ;;  %v2481_v13 = vld [vmem:[%s5119_s3 + $0x268] sm:$0xf]  ;;  %v3286_v14 = vld [vmem:[%s5119_s3 + $0x274] sm:$0xf0]  ;;  %v2374_v15 = vor.u32 %v3256_v6, %v2371_v7  ;;  %v2502_v16 = vor.u32 %v3288_v8, %v2499_v9 }
  0x4c   :  { %763 = vmatpush.bf16.msra.mxu0 %v2514_v62  ;;  %v3220_v18 = vld [vmem:[%s5119_s3 + $0x6c] sm:$0xf]  ;;  %v2227_v19 = vld [vmem:[%s5119_s3 + $0x78] sm:$0xf0]  ;;  %v2482_v25 = vor.u32 %v3286_v14, %v2481_v13  ;;  %v2465_v27 = vld [vmem:[%s5119_s3 + $0x248] sm:$0xf] }
  0x4d   :  { %776 = vmatpush.bf16.msra.mxu1 %v2262_v63  ;;  %802 = vmatpush.bf16.msra.mxu3 %v2518_v3  ;;  %v3252_v21 = vld [vmem:[%s5119_s3 + $0x16c] sm:$0xf]  ;;  %v2355_v22 = vld [vmem:[%s5119_s3 + $0x178] sm:$0xf0]  ;;  %v2230_v26 = vor.u32 %v3220_v18, %v2227_v19  ;;  %v3282_v28 = vld [vmem:[%s5119_s3 + $0x254] sm:$0xf0] }
  0x4e   :  { %789 = vmatpush.bf16.msra.mxu2 %v2390_v2  ;;  %v3284_v23 = vld [vmem:[%s5119_s3 + $0x26c] sm:$0xf]  ;;  %v2483_v24 = vld [vmem:[%s5119_s3 + $0x278] sm:$0xf0]  ;;  %v2358_v29 = vor.u32 %v3252_v21, %v2355_v22  ;;  %v2466_v37 = vor.u32 %v3282_v28, %v2465_v27  ;;  %v2449_v39 = vld [vmem:[%s5119_s3 + $0x228] sm:$0xf] }
  0x4f   :  { %v2486_v30 = vor.u32 %v3284_v23, %v2483_v24  ;;  %v3216_v31 = vld [vmem:[%s5119_s3 + $0x4c] sm:$0xf]  ;;  %v2211_v32 = vld [vmem:[%s5119_s3 + $0x58] sm:$0xf0]  ;;  %v3278_v40 = vld [vmem:[%s5119_s3 + $0x234] sm:$0xf0] }
  0x50   :  { %764 = vmatpush.bf16.msra.mxu0 %v2498_v10  ;;  %v3248_v33 = vld [vmem:[%s5119_s3 + $0x14c] sm:$0xf]  ;;  %v2339_v34 = vld [vmem:[%s5119_s3 + $0x158] sm:$0xf0]  ;;  %v2214_v38 = vor.u32 %v3216_v31, %v2211_v32  ;;  %v2450_v49 = vor.u32 %v3278_v40, %v2449_v39  ;;  %v2433_v51 = vld [vmem:[%s5119_s3 + $0x208] sm:$0xf] }
  0x51   :  { %777 = vmatpush.bf16.msra.mxu1 %v2246_v11  ;;  %803 = vmatpush.bf16.msra.mxu3 %v2502_v16  ;;  %v3280_v35 = vld [vmem:[%s5119_s3 + $0x24c] sm:$0xf]  ;;  %v2467_v36 = vld [vmem:[%s5119_s3 + $0x258] sm:$0xf0]  ;;  %v2342_v41 = vor.u32 %v3248_v33, %v2339_v34  ;;  %v3274_v52 = vld [vmem:[%s5119_s3 + $0x214] sm:$0xf0] }
  0x52   :  { %790 = vmatpush.bf16.msra.mxu2 %v2374_v15  ;;  %v2470_v42 = vor.u32 %v3280_v35, %v2467_v36  ;;  %v3212_v43 = vld [vmem:[%s5119_s3 + $0x2c] sm:$0xf]  ;;  %v2195_v44 = vld [vmem:[%s5119_s3 + $0x38] sm:$0xf0]  ;;  %v2665_v61 = vld [vmem:[%s5121_s5 + $0xe0] sm:$0xf]  ;;  %v2434_v1 = vor.u32 %v3274_v52, %v2433_v51 }
  0x53   :  { %v3244_v45 = vld [vmem:[%s5119_s3 + $0x12c] sm:$0xf]  ;;  %v2323_v46 = vld [vmem:[%s5119_s3 + $0x138] sm:$0xf0]  ;;  %v2198_v50 = vor.u32 %v3212_v43, %v2195_v44  ;;  %v3333_v62 = vld [vmem:[%s5121_s5 + $0xec] sm:$0xf0] }
  0x54   :  { %765 = vmatpush.bf16.msra.mxu0 %v2482_v25  ;;  %v3276_v47 = vld [vmem:[%s5119_s3 + $0x22c] sm:$0xf]  ;;  %v2451_v48 = vld [vmem:[%s5119_s3 + $0x238] sm:$0xf0]  ;;  %v2326_v54 = vor.u32 %v3244_v45, %v2323_v46  ;;  %v2793_v63 = vld [vmem:[%s5121_s5 + $0x1e0] sm:$0xf]  ;;  %v2666_v5 = vor.u32 %v3333_v62, %v2665_v61 }
  0x55   :  { %778 = vmatpush.bf16.msra.mxu1 %v2230_v26  ;;  %804 = vmatpush.bf16.msra.mxu3 %v2486_v30  ;;  %v3208_v53 = vld [vmem:[%s5119_s3 + $0xc] sm:$0xf]  ;;  %v2454_v55 = vor.u32 %v3276_v47, %v2451_v48  ;;  %v2179_v56 = vld [vmem:[%s5119_s3 + $0x18] sm:$0xf0]  ;;  %v3365_v0 = vld [vmem:[%s5121_s5 + $0x1ec] sm:$0xf0] }
  0x56   :  { %791 = vmatpush.bf16.msra.mxu2 %v2358_v29  ;;  %v3240_v57 = vld [vmem:[%s5119_s3 + $0x10c] sm:$0xf]  ;;  %v2307_v58 = vld [vmem:[%s5119_s3 + $0x118] sm:$0xf0]  ;;  %v2182_v2 = vor.u32 %v3208_v53, %v2179_v56  ;;  %v2649_v6 = vld [vmem:[%s5121_s5 + $0xc0] sm:$0xf]  ;;  %v2794_v7 = vor.u32 %v3365_v0, %v2793_v63 }
  0x57   :  { %v3272_v59 = vld [vmem:[%s5119_s3 + $0x20c] sm:$0xf]  ;;  %v2435_v60 = vld [vmem:[%s5119_s3 + $0x218] sm:$0xf0]  ;;  %v2310_v3 = vor.u32 %v3240_v57, %v2307_v58  ;;  %v3329_v8 = vld [vmem:[%s5121_s5 + $0xcc] sm:$0xf0] }
  0x58   :  { %766 = vmatpush.bf16.msra.mxu0 %v2466_v37  ;;  %v2438_v4 = vor.u32 %v3272_v59, %v2435_v60  ;;  %v2777_v9 = vld [vmem:[%s5121_s5 + $0x1c0] sm:$0xf]  ;;  %v3361_v10 = vld [vmem:[%s5121_s5 + $0x1cc] sm:$0xf0]  ;;  %v2650_v11 = vor.u32 %v3329_v8, %v2649_v6  ;;  %v2667_v43 = vld [vmem:[%s5121_s5 + $0xf0] sm:$0xf0] }
  0x59   :  { %779 = vmatpush.bf16.msra.mxu1 %v2214_v38  ;;  %805 = vmatpush.bf16.msra.mxu3 %v2470_v42  ;;  %v2633_v13 = vld [vmem:[%s5121_s5 + $0xa0] sm:$0xf]  ;;  %v2778_v14 = vor.u32 %v3361_v10, %v2777_v9  ;;  %v3325_v15 = vld [vmem:[%s5121_s5 + $0xac] sm:$0xf0]  ;;  %v3331_v42 = vld [vmem:[%s5121_s5 + $0xe4] sm:$0xf] }
  0x5a   :  { %792 = vmatpush.bf16.msra.mxu2 %v2342_v41  ;;  %v2761_v16 = vld [vmem:[%s5121_s5 + $0x1a0] sm:$0xf]  ;;  %v3357_v18 = vld [vmem:[%s5121_s5 + $0x1ac] sm:$0xf0]  ;;  %v2634_v19 = vor.u32 %v3325_v15, %v2633_v13  ;;  %v2670_v45 = vor.u32 %v3331_v42, %v2667_v43  ;;  %v3327_v46 = vld [vmem:[%s5121_s5 + $0xc4] sm:$0xf] }
  0x5b   :  { %v2762_v21 = vor.u32 %v3357_v18, %v2761_v16  ;;  %v3321_v22 = vld [vmem:[%s5121_s5 + $0x8c] sm:$0xf0]  ;;  %v2745_v23 = vld [vmem:[%s5121_s5 + $0x180] sm:$0xf]  ;;  %v2651_v47 = vld [vmem:[%s5121_s5 + $0xd0] sm:$0xf0] }
  0x5c   :  { %767 = vmatpush.bf16.msra.mxu0 %v2450_v49  ;;  %v2601_v24 = vld [vmem:[%s5121_s5 + $0x60] sm:$0xf]  ;;  %v3317_v26 = vld [vmem:[%s5121_s5 + $0x6c] sm:$0xf0]  ;;  %v2654_v48 = vor.u32 %v3327_v46, %v2651_v47  ;;  %v3323_v49 = vld [vmem:[%s5121_s5 + $0xa4] sm:$0xf] }
  0x5d   :  { %780 = vmatpush.bf16.msra.mxu1 %v2198_v50  ;;  %806 = vmatpush.bf16.msra.mxu3 %v2454_v55  ;;  %v2729_v27 = vld [vmem:[%s5121_s5 + $0x160] sm:$0xf]  ;;  %v3349_v28 = vld [vmem:[%s5121_s5 + $0x16c] sm:$0xf0]  ;;  %v2602_v29 = vor.u32 %v3317_v26, %v2601_v24  ;;  %v2635_v50 = vld [vmem:[%s5121_s5 + $0xb0] sm:$0xf0] }
  0x5e   :  { %793 = vmatpush.bf16.msra.mxu2 %v2326_v54  ;;  %v2585_v30 = vld [vmem:[%s5121_s5 + $0x40] sm:$0xf]  ;;  %v2730_v31 = vor.u32 %v3349_v28, %v2729_v27  ;;  %v3313_v32 = vld [vmem:[%s5121_s5 + $0x4c] sm:$0xf0]  ;;  %v2638_v51 = vor.u32 %v3323_v49, %v2635_v50  ;;  %v3319_v52 = vld [vmem:[%s5121_s5 + $0x84] sm:$0xf] }
  0x5f   :  { %v2713_v33 = vld [vmem:[%s5121_s5 + $0x140] sm:$0xf]  ;;  %v3345_v34 = vld [vmem:[%s5121_s5 + $0x14c] sm:$0xf0]  ;;  %v2586_v35 = vor.u32 %v3313_v32, %v2585_v30  ;;  %v2619_v53 = vld [vmem:[%s5121_s5 + $0x90] sm:$0xf0] }
  0x60   :  { %768 = vmatpush.bf16.msra.mxu0 %v2434_v1  ;;  %v2714_v36 = vor.u32 %v3345_v34, %v2713_v33  ;;  %v2569_v37 = vld [vmem:[%s5121_s5 + $0x20] sm:$0xf]  ;;  %v3309_v38 = vld [vmem:[%s5121_s5 + $0x2c] sm:$0xf0]  ;;  %v2622_v54 = vor.u32 %v3319_v52, %v2619_v53  ;;  %v3315_v55 = vld [vmem:[%s5121_s5 + $0x64] sm:$0xf] }
  0x61   :  { %781 = vmatpush.bf16.msra.mxu1 %v2182_v2  ;;  %807 = vmatpush.bf16.msra.mxu3 %v2438_v4  ;;  %v2570_v39 = vor.u32 %v3309_v38, %v2569_v37  ;;  %v2553_v40 = vld [vmem:[%s5121_s5] sm:$0xf]  ;;  %v3305_v41 = vld [vmem:[%s5121_s5 + $0xc] sm:$0xf0]  ;;  %v2603_v56 = vld [vmem:[%s5121_s5 + $0x70] sm:$0xf0] }
  0x62   :  { %794 = vmatpush.bf16.msra.mxu2 %v2310_v3  ;;  %v2554_v44 = vor.u32 %v3305_v41, %v2553_v40  ;;  %v2697_v57 = vld [vmem:[%s5121_s5 + $0x120] sm:$0xf]  ;;  %v3341_v58 = vld [vmem:[%s5121_s5 + $0x12c] sm:$0xf0]  ;;  %v2606_v60 = vor.u32 %v3315_v55, %v2603_v56  ;;  %v3311_v61 = vld [vmem:[%s5121_s5 + $0x44] sm:$0xf] }
  0x63   :  { %769 = vmatmul.bf16.vlgmr.msra.gmra.mxu0 %v3829_v12  ;;  %v2698_v59 = vor.u32 %v3341_v58, %v2697_v57  ;;  %v2921_v62 = vld [vmem:[%s5121_s5 + $0x2e0] sm:$0xf]  ;;  %v3397_v63 = vld [vmem:[%s5121_s5 + $0x2ec] sm:$0xf0]  ;;  %v2587_v0 = vld [vmem:[%s5121_s5 + $0x50] sm:$0xf0] }
  0x64   :  { %1599 = vmatpush.bf16.msrb.mxu0 %v2666_v5  ;;  %782 = vmatmul.bf16.vlgmr.msra.gmra.mxu1 %v3837_v17  ;;  %v2617_v17 = vld [vmem:[%s5121_s5 + $0x80] sm:$0xf]  ;;  %v2922_v1 = vor.u32 %v3397_v63, %v2921_v62  ;;  %v3337_v3 = vld [vmem:[%s5121_s5 + $0x10c] sm:$0xf0]  ;;  %v3363_v5 = vld [vmem:[%s5121_s5 + $0x1e4] sm:$0xf]  ;;  %v2590_v8 = vor.u32 %v3311_v61, %v2587_v0 }
  0x65   :  { %1612 = vmatpush.bf16.msrb.mxu1 %v2794_v7  ;;  %795 = vmatmul.bf16.vlgmr.msra.gmra.mxu2 %v3839_v20  ;;  %v2618_v20 = vor.u32 %v3321_v22, %v2617_v17  ;;  %v2681_v2 = vld [vmem:[%s5121_s5 + $0x100] sm:$0xf]  ;;  %v2795_v6 = vld [vmem:[%s5121_s5 + $0x1f0] sm:$0xf0]  ;;  %v3393_v10 = vld [vmem:[%s5121_s5 + $0x2cc] sm:$0xf0] }
  0x66   :  { %808 = vmatmul.bf16.vlgmr.msra.gmra.mxu3 %v3829_v12  ;;  %v3353_v12 = vld [vmem:[%s5121_s5 + $0x18c] sm:$0xf0]  ;;  %v2682_v4 = vor.u32 %v3337_v3, %v2681_v2  ;;  %1625 = vmatpush.bf16.msrb.mxu2 %v2922_v1  ;;  %v2798_v7 = vor.u32 %v3363_v5, %v2795_v6  ;;  %v2905_v9 = vld [vmem:[%s5121_s5 + $0x2c0] sm:$0xf]  ;;  %v2571_v13 = vld [vmem:[%s5121_s5 + $0x30] sm:$0xf0] }
  0x67   :  { %v2746_v25 = vor.u32 %v3353_v12, %v2745_v23  ;;  %v3359_v15 = vld [vmem:[%s5121_s5 + $0x1c4] sm:$0xf]  ;;  %v2779_v16 = vld [vmem:[%s5121_s5 + $0x1d0] sm:$0xf0]  ;;  %v2889_v22 = vld [vmem:[%s5121_s5 + $0x2a0] sm:$0xf] }
  0x68   :  { %1600 = vmatpush.bf16.msrb.mxu0 %v2650_v11  ;;  %v3307_v11 = vld [vmem:[%s5121_s5 + $0x24] sm:$0xf]  ;;  %v2782_v17 = vor.u32 %v3359_v15, %v2779_v16  ;;  %v3389_v23 = vld [vmem:[%s5121_s5 + $0x2ac] sm:$0xf0]  ;;  %v3049_v12 = vld [vmem:[%s5121_s5 + $0x3e0] sm:$0xf] }
  0x69   :  { %1613 = vmatpush.bf16.msrb.mxu1 %v2778_v14  ;;  %v2906_v14 = vor.u32 %v3393_v10, %v2905_v9  ;;  %v3303_v18 = vld [vmem:[%s5121_s5 + $0x4] sm:$0xf]  ;;  %v3429_v24 = vld [vmem:[%s5121_s5 + $0x3ec] sm:$0xf0]  ;;  %v2763_v26 = vld [vmem:[%s5121_s5 + $0x1b0] sm:$0xf0] }
  0x6a   :  { %v3050_v27 = vor.u32 %v3429_v24, %v3049_v12  ;;  %v2873_v30 = vld [vmem:[%s5121_s5 + $0x280] sm:$0xf]  ;;  %v3425_v34 = vld [vmem:[%s5121_s5 + $0x3cc] sm:$0xf0]  ;;  %v3343_v55 = vld [vmem:[%s5121_s5 + $0x144] sm:$0xf] }
  0x6b   :  { %1626 = vmatpush.bf16.msrb.mxu2 %v2906_v14  ;;  %v3033_v32 = vld [vmem:[%s5121_s5 + $0x3c0] sm:$0xf]  ;;  %v3381_v40 = vld [vmem:[%s5121_s5 + $0x26c] sm:$0xf0]  ;;  %v2715_v56 = vld [vmem:[%s5121_s5 + $0x150] sm:$0xf0] }
  0x6c   :  { %1601 = vmatpush.bf16.msrb.mxu0 %v2634_v19  ;;  %v2555_v19 = vld [vmem:[%s5121_s5 + $0x10] sm:$0xf0]  ;;  %1638 = vmatpush.bf16.msrb.mxu3 %v3050_v27  ;;  %v3034_v37 = vor.u32 %v3425_v34, %v3033_v32  ;;  %v3017_v41 = vld [vmem:[%s5121_s5 + $0x3a0] sm:$0xf]  ;;  %v3421_v43 = vld [vmem:[%s5121_s5 + $0x3ac] sm:$0xf0]  ;;  %v2718_v58 = vor.u32 %v3343_v55, %v2715_v56 }
  0x6d   :  { %1614 = vmatpush.bf16.msrb.mxu1 %v2762_v21  ;;  %v2574_v21 = vor.u32 %v3307_v11, %v2571_v13  ;;  %v3018_v46 = vor.u32 %v3421_v43, %v3017_v41  ;;  %v2841_v49 = vld [vmem:[%s5121_s5 + $0x240] sm:$0xf]  ;;  %v3377_v50 = vld [vmem:[%s5121_s5 + $0x24c] sm:$0xf0]  ;;  %v3339_v1 = vld [vmem:[%s5121_s5 + $0x124] sm:$0xf] }
  0x6e   :  { %v3001_v52 = vld [vmem:[%s5121_s5 + $0x380] sm:$0xf]  ;;  %v3417_v53 = vld [vmem:[%s5121_s5 + $0x38c] sm:$0xf0]  ;;  %v2699_v2 = vld [vmem:[%s5121_s5 + $0x130] sm:$0xf0] }
  0x6f   :  { %v2985_v61 = vld [vmem:[%s5121_s5 + $0x360] sm:$0xf]  ;;  %v3413_v63 = vld [vmem:[%s5121_s5 + $0x36c] sm:$0xf0]  ;;  %v2702_v5 = vor.u32 %v3339_v1, %v2699_v2  ;;  %v3395_v13 = vld [vmem:[%s5121_s5 + $0x2e4] sm:$0xf] }
  0x70   :  { %1602 = vmatpush.bf16.msrb.mxu0 %v2618_v20  ;;  %v2890_v20 = vor.u32 %v3389_v23, %v2889_v22  ;;  %1639 = vmatpush.bf16.msrb.mxu3 %v3034_v37  ;;  %v2986_v0 = vor.u32 %v3413_v63, %v2985_v61  ;;  %v2969_v9 = vld [vmem:[%s5121_s5 + $0x340] sm:$0xf]  ;;  %v3409_v11 = vld [vmem:[%s5121_s5 + $0x34c] sm:$0xf0]  ;;  %v2923_v14 = vld [vmem:[%s5121_s5 + $0x2f0] sm:$0xf0] }
  0x71   :  { %1615 = vmatpush.bf16.msrb.mxu1 %v2746_v25  ;;  %v3355_v25 = vld [vmem:[%s5121_s5 + $0x1a4] sm:$0xf]  ;;  %v2970_v16 = vor.u32 %v3409_v11, %v2969_v9  ;;  %v2673_v23 = vld [vmem:[%s5121_s5 + $0xe8] sm:$0xf]  ;;  %v2953_v12 = vld [vmem:[%s5121_s5 + $0x320] sm:$0xf] }
  0x72   :  { %v2766_v28 = vor.u32 %v3355_v25, %v2763_v26  ;;  %1627 = vmatpush.bf16.msrb.mxu2 %v2890_v20  ;;  %v3405_v20 = vld [vmem:[%s5121_s5 + $0x32c] sm:$0xf0]  ;;  %v3334_v25 = vld [vmem:[%s5121_s5 + $0xf4] sm:$0xf0]  ;;  %v3391_v27 = vld [vmem:[%s5121_s5 + $0x2c4] sm:$0xf] }
  0x73   :  { %v2954_v26 = vor.u32 %v3405_v20, %v2953_v12  ;;  %v2657_v34 = vld [vmem:[%s5121_s5 + $0xc8] sm:$0xf]  ;;  %v2937_v37 = vld [vmem:[%s5121_s5 + $0x300] sm:$0xf]  ;;  %v2891_v41 = vld [vmem:[%s5121_s5 + $0x2b0] sm:$0xf0] }
  0x74   :  { %1603 = vmatpush.bf16.msrb.mxu0 %v2602_v29  ;;  %v2558_v29 = vor.u32 %v3303_v18, %v2555_v19  ;;  %1640 = vmatpush.bf16.msrb.mxu3 %v3018_v46  ;;  %v2926_v18 = vor.u32 %v3395_v13, %v2923_v14  ;;  %v3335_v19 = vld [vmem:[%s5121_s5 + $0x104] sm:$0xf]  ;;  %v3035_v56 = vld [vmem:[%s5121_s5 + $0x3d0] sm:$0xf0]  ;;  %s2155_s17 = sshll.u32 %s5125_s9, 4  ;;  %s2156_s17 = int_to_ptr.hbm [resolvable:$true] %s2155_s17 }
  0x75   :  { %1616 = vmatpush.bf16.msrb.mxu1 %v2730_v31  ;;  %v3385_v31 = vld [vmem:[%s5121_s5 + $0x28c] sm:$0xf0]  ;;  %v2859_v63 = vld [vmem:[%s5121_s5 + $0x270] sm:$0xf0] }
  0x76   :  { %v2874_v33 = vor.u32 %v3385_v31, %v2873_v30  ;;  %v3019_v2 = vld [vmem:[%s5121_s5 + $0x3b0] sm:$0xf0] }
  0x77   :  { %v2843_v9 = vld [vmem:[%s5121_s5 + $0x250] sm:$0xf0] }
  0x78   :  { %1604 = vmatpush.bf16.msrb.mxu0 %v2586_v35  ;;  %v3351_v35 = vld [vmem:[%s5121_s5 + $0x184] sm:$0xf]  ;;  %1628 = vmatpush.bf16.msrb.mxu2 %v2874_v33  ;;  %v2674_v33 = vor.u32 %v3334_v25, %v2673_v23  ;;  %v3003_v13 = vld [vmem:[%s5121_s5 + $0x390] sm:$0xf0] }
  0x79   :  { %1617 = vmatpush.bf16.msrb.mxu1 %v2714_v36  ;;  %v2747_v36 = vld [vmem:[%s5121_s5 + $0x190] sm:$0xf0] }
  0x7a   :  { %v2750_v38 = vor.u32 %v3351_v35, %v2747_v36  ;;  %v3330_v35 = vld [vmem:[%s5121_s5 + $0xd4] sm:$0xf0]  ;;  %v2987_v12 = vld [vmem:[%s5121_s5 + $0x370] sm:$0xf0] }
  0x7c   :  { %1605 = vmatpush.bf16.msrb.mxu0 %v2570_v39  ;;  %v2857_v39 = vld [vmem:[%s5121_s5 + $0x260] sm:$0xf] }
  0x7d   :  { %1618 = vmatpush.bf16.msrb.mxu1 %v2698_v59  ;;  %v2858_v42 = vor.u32 %v3381_v40, %v2857_v39  ;;  %v2825_v59 = vld [vmem:[%s5121_s5 + $0x220] sm:$0xf]  ;;  %v3401_v39 = vld [vmem:[%s5121_s5 + $0x30c] sm:$0xf0]  ;;  %v3387_v40 = vld [vmem:[%s5121_s5 + $0x2a4] sm:$0xf] }
  0x7e   :  { %v2894_v43 = vor.u32 %v3387_v40, %v2891_v41  ;;  %v2561_v41 = vld [vmem:[%s5121_s5 + $0x8] sm:$0xf] }
  0x7f   :  { %1629 = vmatpush.bf16.msrb.mxu2 %v2858_v42  ;;  %v2938_v42 = vor.u32 %v3401_v39, %v2937_v37  ;;  %v3366_v37 = vld [vmem:[%s5121_s5 + $0x1f4] sm:$0xf0] }
  0x80   :  { %1606 = vmatpush.bf16.msrb.mxu0 %v2554_v44  ;;  %v3347_v44 = vld [vmem:[%s5121_s5 + $0x164] sm:$0xf] }
  0x81   :  { %1619 = vmatpush.bf16.msrb.mxu1 %v2682_v4 }
  0x84   :  { %1651 = vmatpush.bf16.msra.mxu0 %v2670_v45  ;;  %v2731_v45 = vld [vmem:[%s5121_s5 + $0x170] sm:$0xf0] }
  0x85   :  { %1664 = vmatpush.bf16.msra.mxu1 %v2798_v7  ;;  %v2734_v47 = vor.u32 %v3347_v44, %v2731_v45  ;;  %v2809_v7 = vld [vmem:[%s5121_s5 + $0x200] sm:$0xf]  ;;  %v3427_v44 = vld [vmem:[%s5121_s5 + $0x3e4] sm:$0xf]  ;;  %v3051_v45 = vld [vmem:[%s5121_s5 + $0x3f0] sm:$0xf0] }
  0x86   :  { %v3054_v46 = vor.u32 %v3427_v44, %v3051_v45  ;;  %v3403_v44 = vld [vmem:[%s5121_s5 + $0x324] sm:$0xf] }
  0x88   :  { %1652 = vmatpush.bf16.msra.mxu0 %v2654_v48  ;;  %v4408_v48 = vld [vmem:[%s5120_s4] sm:$0xf]  ;;  %s3491_s4 = smov [#allocation2]  }
  0x89   :  { %1665 = vmatpush.bf16.msra.mxu1 %v2782_v17  ;;  %v158_v57 = vperm.slane %v4408_v48, 0  ;;  %v2683_v17 = vld [vmem:[%s5121_s5 + $0x110] sm:$0xf0]  ;;  %s2153_s14 = sshll.u32 %s3491_s4, 4  ;;  %s2154_s14 = int_to_ptr.vmem [resolvable:$true] %s2153_s14 }
  0x8c   :  { %1653 = vmatpush.bf16.msra.mxu0 %v2638_v51  ;;  %v2842_v51 = vor.u32 %v3377_v50, %v2841_v49  ;;  %v2641_v49 = vld [vmem:[%s5121_s5 + $0xa8] sm:$0xf]  ;;  %v3326_v50 = vld [vmem:[%s5121_s5 + $0xb4] sm:$0xf0] }
  0x8d   :  { %1666 = vmatpush.bf16.msra.mxu1 %v2766_v28  ;;  %v2907_v28 = vld [vmem:[%s5121_s5 + $0x2d0] sm:$0xf0] }
  0x8e   :  { %1630 = vmatpush.bf16.msrb.mxu2 %v2842_v51 }
  0x90   :  { %1654 = vmatpush.bf16.msra.mxu0 %v2622_v54  ;;  %v3002_v54 = vor.u32 %v3417_v53, %v3001_v52  ;;  %v3383_v52 = vld [vmem:[%s5121_s5 + $0x284] sm:$0xf]  ;;  %v2875_v53 = vld [vmem:[%s5121_s5 + $0x290] sm:$0xf0] }
  0x91   :  { %1667 = vmatpush.bf16.msra.mxu1 %v2750_v38  ;;  %v2878_v55 = vor.u32 %v3383_v52, %v2875_v53  ;;  %v2785_v53 = vld [vmem:[%s5121_s5 + $0x1c8] sm:$0xf] }
  0x92   :  { %1641 = vmatpush.bf16.msrb.mxu3 %v3002_v54  ;;  %v3423_v54 = vld [vmem:[%s5121_s5 + $0x3c4] sm:$0xf] }
  0x94   :  { %1655 = vmatpush.bf16.msra.mxu0 %v2606_v60  ;;  %v3373_v60 = vld [vmem:[%s5121_s5 + $0x22c] sm:$0xf0] }
  0x95   :  { %1668 = vmatpush.bf16.msra.mxu1 %v2734_v47  ;;  %v2826_v62 = vor.u32 %v3373_v60, %v2825_v59  ;;  %v2658_v47 = vor.u32 %v3330_v35, %v2657_v34  ;;  %v2625_v59 = vld [vmem:[%s5121_s5 + $0x88] sm:$0xf]  ;;  %v3322_v60 = vld [vmem:[%s5121_s5 + $0x94] sm:$0xf0]  ;;  %v2971_v34 = vld [vmem:[%s5121_s5 + $0x350] sm:$0xf0] }
  0x96   :  { %1642 = vmatpush.bf16.msrb.mxu3 %v2986_v0  ;;  %v3419_v0 = vld [vmem:[%s5121_s5 + $0x3a4] sm:$0xf] }
  0x97   :  { %1631 = vmatpush.bf16.msrb.mxu2 %v2826_v62  ;;  %v3379_v62 = vld [vmem:[%s5121_s5 + $0x264] sm:$0xf] }
  0x98   :  { %1656 = vmatpush.bf16.msra.mxu0 %v2590_v8  ;;  %v3369_v8 = vld [vmem:[%s5121_s5 + $0x20c] sm:$0xf0]  ;;  %v2862_v1 = vor.u32 %v3379_v62, %v2859_v63  ;;  %v3328_v63 = vld [vmem:[%s5121_s5 + $0xcc] sm:$0xf] }
  0x99   :  { %1669 = vmatpush.bf16.msra.mxu1 %v2718_v58  ;;  %v2810_v10 = vor.u32 %v3369_v8, %v2809_v7  ;;  %v2642_v58 = vor.u32 %v3326_v50, %v2641_v49  ;;  %v3318_v7 = vld [vmem:[%s5121_s5 + $0x74] sm:$0xf0]  ;;  %v3375_v8 = vld [vmem:[%s5121_s5 + $0x244] sm:$0xf]  ;;  %v2955_v49 = vld [vmem:[%s5121_s5 + $0x330] sm:$0xf0] }
  0x9a   :  { %1643 = vmatpush.bf16.msrb.mxu3 %v2970_v16  ;;  %v2846_v11 = vor.u32 %v3375_v8, %v2843_v9  ;;  %v2593_v16 = vld [vmem:[%s5121_s5 + $0x48] sm:$0xf] }
  0x9b   :  { %1632 = vmatpush.bf16.msrb.mxu2 %v2810_v10  ;;  %v3415_v10 = vld [vmem:[%s5121_s5 + $0x384] sm:$0xf] }
  0x9c   :  { %1657 = vmatpush.bf16.msra.mxu0 %v2574_v21  ;;  %v2686_v21 = vor.u32 %v3335_v19, %v2683_v17  ;;  %v3006_v14 = vor.u32 %v3415_v10, %v3003_v13  ;;  %v3371_v17 = vld [vmem:[%s5121_s5 + $0x224] sm:$0xf]  ;;  %v2753_v10 = vld [vmem:[%s5121_s5 + $0x188] sm:$0xf] }
  0x9d   :  { %1670 = vmatpush.bf16.msra.mxu1 %v2702_v5  ;;  %v159_v5 = vperm.slane %v4408_v48, 1 }
  0x9e   :  { %1644 = vmatpush.bf16.msrb.mxu3 %v2954_v26 }
  0x9f   :  { %1677 = vmatpush.bf16.msra.mxu2 %v2926_v18  ;;  %v3314_v18 = vld [vmem:[%s5121_s5 + $0x54] sm:$0xf0] }
  0xa0   :  { %1658 = vmatpush.bf16.msra.mxu0 %v2558_v29  ;;  %v2910_v29 = vor.u32 %v3391_v27, %v2907_v28  ;;  %v2594_v26 = vor.u32 %v3314_v18, %v2593_v16  ;;  %v2577_v27 = vld [vmem:[%s5121_s5 + $0x28] sm:$0xf]  ;;  %v2627_v16 = vld [vmem:[%s5121_s5 + $0x98] sm:$0xf0] }
  0xa1   :  { %1671 = vmatpush.bf16.msra.mxu1 %v2686_v21  ;;  %v2827_v21 = vld [vmem:[%s5121_s5 + $0x230] sm:$0xf0]  ;;  %v2737_v18 = vld [vmem:[%s5121_s5 + $0x168] sm:$0xf] }
  0xa2   :  { %1645 = vmatpush.bf16.msrb.mxu3 %v2938_v42  ;;  %v2830_v23 = vor.u32 %v3371_v17, %v2827_v21  ;;  %v160_v17 = vperm.slane %v4408_v48, 2 }
  0xa3   :  { %v666_v3 = vpop.f32.mrf.mxu0  ;;  %1678 = vmatpush.bf16.msra.mxu2 %v2910_v29  ;;  %v3310_v29 = vld [vmem:[%s5121_s5 + $0x34] sm:$0xf0] }
  0xa4   :  { %v679_v4 = vpop.f32.mrf.mxu1  ;;  %v667_v6 = vadd.f32 %v666_v3, %v158_v57  ;;  %v3038_v57 = vor.u32 %v3423_v54, %v3035_v56  ;;  %v3022_v3 = vor.u32 %v3419_v0, %v3019_v2  ;;  %v2578_v40 = vor.u32 %v3310_v29, %v2577_v27  ;;  %v3362_v54 = vld [vmem:[%s5121_s5 + $0x1d4] sm:$0xf0]  ;;  %v2659_v0 = vld [vmem:[%s5121_s5 + $0xd8] sm:$0xf0]  ;;  %v2769_v2 = vld [vmem:[%s5121_s5 + $0x1a8] sm:$0xf] }
  0xa5   :  { %v2786_v62 = vor.u32 %v3362_v54, %v2785_v53  ;;  %v2595_v29 = vld [vmem:[%s5121_s5 + $0x58] sm:$0xf0] }
  0xa6   :  { %v680_v15 = vadd.f32 %v679_v4, %v667_v6  ;;  %1690 = vmatpush.bf16.msra.mxu3 %v3054_v46  ;;  %v2626_v4 = vor.u32 %v3322_v60, %v2625_v59  ;;  %v2609_v6 = vld [vmem:[%s5121_s5 + $0x68] sm:$0xf]  ;;  %v3332_v46 = vld [vmem:[%s5121_s5 + $0xec] sm:$0xf]  ;;  %v3399_v60 = vld [vmem:[%s5121_s5 + $0x304] sm:$0xf] }
  0xa7   :  { %1679 = vmatpush.bf16.msra.mxu2 %v2894_v43  ;;  %v3306_v43 = vld [vmem:[%s5121_s5 + $0x14] sm:$0xf0] }
  0xa8   :  { %v2562_v56 = vor.u32 %v3306_v43, %v2561_v41  ;;  %v3398_v41 = vld [vmem:[%s5121_s5 + $0x2f4] sm:$0xf0]  ;;  %v2689_v43 = vld [vmem:[%s5121_s5 + $0x108] sm:$0xf] }
  0xaa   :  { %v692_v22 = vpop.f32.mrf.mxu2  ;;  %1691 = vmatpush.bf16.msra.mxu3 %v3038_v57 }
  0xab   :  { %v693_v24 = vadd.f32 %v692_v22, %v680_v15  ;;  %v668_v31 = vpop.f32.mrf.mxu0  ;;  %v705_v36 = vpop.f32.mrf.mxu3  ;;  %1680 = vmatpush.bf16.msra.mxu2 %v2878_v55  ;;  %v2610_v15 = vor.u32 %v3318_v7, %v2609_v6  ;;  %v3411_v22 = vld [vmem:[%s5121_s5 + $0x364] sm:$0xf]  ;;  %v2958_v55 = vor.u32 %v3403_v44, %v2955_v49  ;;  %v3324_v6 = vld [vmem:[%s5121_s5 + $0xac] sm:$0xf]  ;;  %v2643_v7 = vld [vmem:[%s5121_s5 + $0xb8] sm:$0xf0] }
  0xac   :  { %v681_v32 = vpop.f32.mrf.mxu1  ;;  %v706_v19 = vadd.f32 %v705_v36, %v159_v5  ;;  %v2990_v20 = vor.u32 %v3411_v22, %v2987_v12  ;;  %v2811_v31 = vld [vmem:[%s5121_s5 + $0x210] sm:$0xf0]  ;;  %v2801_v36 = vld [vmem:[%s5121_s5 + $0x1e8] sm:$0xf]  ;;  %v2646_v13 = vor.u32 %v3324_v6, %v2643_v7  ;;  %v2611_v12 = vld [vmem:[%s5121_s5 + $0x78] sm:$0xf0] }
  0xad   :  { %v813_v30 = vmax.f32 %v693_v24, 0.0  ;;  %v2802_v45 = vor.u32 %v3366_v37, %v2801_v36  ;;  %v2929_v37 = vld [vmem:[%s5121_s5 + $0x2e8] sm:$0xf]  ;;  %v3338_v44 = vld [vmem:[%s5121_s5 + $0x114] sm:$0xf0] }
  0xae   :  { %1692 = vmatpush.bf16.msra.mxu3 %v3022_v3  ;;  %v3358_v3 = vld [vmem:[%s5121_s5 + $0x1b4] sm:$0xf0]  ;;  %v2690_v54 = vor.u32 %v3338_v44, %v2689_v43 }
  0xaf   :  { %v4498_v38 = vpack.c.bf16 %v813_v30, %v813_v30  ;;  %1681 = vmatpush.bf16.msra.mxu2 %v2862_v1  ;;  %v3367_v30 = vld [vmem:[%s5121_s5 + $0x204] sm:$0xf]  ;;  %v2770_v5 = vor.u32 %v3358_v3, %v2769_v2  ;;  %v3390_v6 = vld [vmem:[%s5121_s5 + $0x2b4] sm:$0xf0] }
  0xb0   :  { %v2814_v32 = vor.u32 %v3367_v30, %v2811_v31  ;;  %v2705_v30 = vld [vmem:[%s5121_s5 + $0x128] sm:$0xf]  ;;  %v3342_v31 = vld [vmem:[%s5121_s5 + $0x134] sm:$0xf0] }
  0xb1   :  { %1607 = vmatmul.bf16.vlgmr.msrb.gmra.mxu0 %v4498_v38 }
  0xb2   :  { %1703 = vmatpush.bf16.msrb.mxu0 %v2674_v33  ;;  %v694_v51 = vpop.f32.mrf.mxu2  ;;  %1693 = vmatpush.bf16.msra.mxu3 %v3006_v14  ;;  %v3407_v33 = vld [vmem:[%s5121_s5 + $0x344] sm:$0xf] }
  0xb3   :  { %v707_v61 = vpop.f32.mrf.mxu3  ;;  %1682 = vmatpush.bf16.msra.mxu2 %v2846_v11  ;;  %v2974_v39 = vor.u32 %v3407_v33, %v2971_v34  ;;  %v3354_v11 = vld [vmem:[%s5121_s5 + $0x194] sm:$0xf0]  ;;  %v161_v34 = vperm.slane %v4408_v48, 3  ;;  %v2579_v48 = vld [vmem:[%s5121_s5 + $0x38] sm:$0xf0] }
  0xb4   :  { %v2939_v61 = vld [vmem:[%s5121_s5 + $0x310] sm:$0xf0]  ;;  %v2754_v14 = vor.u32 %v3354_v11, %v2753_v10  ;;  %v3430_v10 = vld [vmem:[%s5121_s5 + $0x3f4] sm:$0xf0]  ;;  %v3356_v11 = vld [vmem:[%s5121_s5 + $0x1ac] sm:$0xf] }
  0xb5   :  { %v2942_v1 = vor.u32 %v3399_v60, %v2939_v61 }
  0xb6   :  { %1704 = vmatpush.bf16.msrb.mxu0 %v2658_v47  ;;  %1694 = vmatpush.bf16.msra.mxu3 %v2990_v20  ;;  %v2675_v47 = vld [vmem:[%s5121_s5 + $0xf8] sm:$0xf0]  ;;  %v2721_v20 = vld [vmem:[%s5121_s5 + $0x148] sm:$0xf] }
  0xb7   :  { %1683 = vmatpush.bf16.msra.mxu2 %v2830_v23  ;;  %v2678_v59 = vor.u32 %v3332_v46, %v2675_v47  ;;  %v3316_v23 = vld [vmem:[%s5121_s5 + $0x6c] sm:$0xf]  ;;  %v2803_v47 = vld [vmem:[%s5121_s5 + $0x1f8] sm:$0xf0] }
  0xb8   :  { %v3364_v46 = vld [vmem:[%s5121_s5 + $0x1ec] sm:$0xf] }
  0xba   :  { %1705 = vmatpush.bf16.msrb.mxu0 %v2642_v58  ;;  %1695 = vmatpush.bf16.msra.mxu3 %v2974_v39 }
  0xbb   :  { %1684 = vmatpush.bf16.msra.mxu2 %v2814_v32 }
  0xbe   :  { %1706 = vmatpush.bf16.msrb.mxu0 %v2626_v4  ;;  %1696 = vmatpush.bf16.msra.mxu3 %v2958_v55  ;;  %v2662_v4 = vor.u32 %v3328_v63, %v2659_v0  ;;  %v2913_v55 = vld [vmem:[%s5121_s5 + $0x2c8] sm:$0xf]  ;;  %v2787_v63 = vld [vmem:[%s5121_s5 + $0x1d8] sm:$0xf0] }
  0xc0   :  { %v718_v24 = vpop.f32.mrf.mxu0 }
  0xc1   :  { %1659 = vmatmul.bf16.vlgmr.msra.gmra.mxu0 %v4498_v38  ;;  %v731_v25 = vpop.f32.mrf.mxu1  ;;  %v719_v28 = vadd.f32 %v718_v24, %v706_v19  ;;  %v3350_v19 = vld [vmem:[%s5121_s5 + $0x174] sm:$0xf0] }
  0xc2   :  { %1707 = vmatpush.bf16.msrb.mxu0 %v2610_v15  ;;  %1697 = vmatpush.bf16.msra.mxu3 %v2942_v1  ;;  %v3320_v15 = vld [vmem:[%s5121_s5 + $0x8c] sm:$0xf]  ;;  %v2738_v22 = vor.u32 %v3350_v19, %v2737_v18  ;;  %v3346_v24 = vld [vmem:[%s5121_s5 + $0x154] sm:$0xf0]  ;;  %v2881_v18 = vld [vmem:[%s5121_s5 + $0x288] sm:$0xf] }
  0xc3   :  { %v732_v35 = vadd.f32 %v731_v25, %v719_v28  ;;  %v2630_v21 = vor.u32 %v3320_v15, %v2627_v16  ;;  %v2722_v27 = vor.u32 %v3346_v24, %v2721_v20  ;;  %v3312_v28 = vld [vmem:[%s5121_s5 + $0x4c] sm:$0xf]  ;;  %v3386_v19 = vld [vmem:[%s5121_s5 + $0x294] sm:$0xf0] }
  0xc4   :  { %v2598_v36 = vor.u32 %v3312_v28, %v2595_v29  ;;  %v3352_v24 = vld [vmem:[%s5121_s5 + $0x18c] sm:$0xf]  ;;  %v2865_v28 = vld [vmem:[%s5121_s5 + $0x268] sm:$0xf]  ;;  %v3382_v29 = vld [vmem:[%s5121_s5 + $0x274] sm:$0xf0] }
  0xc5   :  { %v814_v42 = vmax.f32 %v732_v35, 0.0 }
  0xc6   :  { %1708 = vmatpush.bf16.msrb.mxu0 %v2594_v26  ;;  %v2614_v26 = vor.u32 %v3316_v23, %v2611_v12  ;;  %v3426_v23 = vld [vmem:[%s5121_s5 + $0x3d4] sm:$0xf0] }
  0xc7   :  { %v4632_v50 = vpack.c.bf16 %v814_v42, %v814_v42  ;;  %v3308_v42 = vld [vmem:[%s5121_s5 + $0x2c] sm:$0xf] }
  0xc8   :  { %v720_v58 = vpop.f32.mrf.mxu0 }
  0xc9   :  { %v757_v52 = vpop.f32.mrf.mxu3  ;;  %v733_v57 = vpop.f32.mrf.mxu1  ;;  %1620 = vmatmul.bf16.vlgmr.msrb.gmra.mxu1 %v4632_v50  ;;  %v3304_v58 = vld [vmem:[%s5121_s5 + $0xc] sm:$0xf] }
  0xca   :  { %v744_v51 = vpop.f32.mrf.mxu2  ;;  %1709 = vmatpush.bf16.msrb.mxu0 %v2578_v40  ;;  %1716 = vmatpush.bf16.msrb.mxu1 %v2802_v45  ;;  %v2706_v40 = vor.u32 %v3342_v31, %v2705_v30  ;;  %v2806_v57 = vor.u32 %v3364_v46, %v2803_v47  ;;  %v3025_v31 = vld [vmem:[%s5121_s5 + $0x3a8] sm:$0xf]  ;;  %v3374_v46 = vld [vmem:[%s5121_s5 + $0x234] sm:$0xf0] }
  0xcb   :  { %v745_v25 = vadd.f32 %v744_v51, %v160_v17  ;;  %v2930_v51 = vor.u32 %v3398_v41, %v2929_v37  ;;  %v3378_v37 = vld [vmem:[%s5121_s5 + $0x254] sm:$0xf0] }
  0xcc   :  { %v3418_v41 = vld [vmem:[%s5121_s5 + $0x394] sm:$0xf0] }
  0xcd   :  { %v758_v32 = vadd.f32 %v757_v52, %v745_v25  ;;  %v2582_v52 = vor.u32 %v3308_v42, %v2579_v48  ;;  %v2755_v25 = vld [vmem:[%s5121_s5 + $0x198] sm:$0xf0]  ;;  %v3344_v42 = vld [vmem:[%s5121_s5 + $0x14c] sm:$0xf] }
  0xce   :  { %1710 = vmatpush.bf16.msrb.mxu0 %v2562_v56  ;;  %1717 = vmatpush.bf16.msrb.mxu1 %v2786_v62  ;;  %v3394_v56 = vld [vmem:[%s5121_s5 + $0x2d4] sm:$0xf0]  ;;  %v3360_v62 = vld [vmem:[%s5121_s5 + $0x1cc] sm:$0xf]  ;;  %v2758_v30 = vor.u32 %v3352_v24, %v2755_v25  ;;  %v2723_v48 = vld [vmem:[%s5121_s5 + $0x158] sm:$0xf0] }
  0xcf   :  { %v2914_v3 = vor.u32 %v3394_v56, %v2913_v55  ;;  %v2726_v47 = vor.u32 %v3344_v42, %v2723_v48  ;;  %v3424_v24 = vld [vmem:[%s5121_s5 + $0x3cc] sm:$0xf]  ;;  %v2995_v42 = vld [vmem:[%s5121_s5 + $0x378] sm:$0xf0] }
  0xd1   :  { %1711 = vmatmul.bf16.vlgmr.msrb.gmra.mxu0 %v4498_v38  ;;  %v759_v9 = vpop.f32.mrf.mxu3 }
  0xd2   :  { %1755 = vmatpush.bf16.msra.mxu0 %v2678_v59  ;;  %v746_v8 = vpop.f32.mrf.mxu2  ;;  %1718 = vmatpush.bf16.msrb.mxu1 %v2770_v5  ;;  %v2563_v59 = vld [vmem:[%s5121_s5 + $0x18] sm:$0xf0]  ;;  %v2897_v5 = vld [vmem:[%s5121_s5 + $0x2a8] sm:$0xf] }
  0xd3   :  { %v2790_v8 = vor.u32 %v3360_v62, %v2787_v63  ;;  %v3057_v9 = vld [vmem:[%s5121_s5 + $0x3e8] sm:$0xf]  ;;  %v2898_v15 = vor.u32 %v3390_v6, %v2897_v5  ;;  %v3396_v62 = vld [vmem:[%s5121_s5 + $0x2ec] sm:$0xf]  ;;  %v2931_v63 = vld [vmem:[%s5121_s5 + $0x2f8] sm:$0xf0] }
  0xd4   :  { %v3058_v16 = vor.u32 %v3430_v10, %v3057_v9  ;;  %v2961_v6 = vld [vmem:[%s5121_s5 + $0x328] sm:$0xf]  ;;  %v2915_v9 = vld [vmem:[%s5121_s5 + $0x2d8] sm:$0xf0] }
  0xd6   :  { %1756 = vmatpush.bf16.msra.mxu0 %v2662_v4  ;;  %1719 = vmatpush.bf16.msrb.mxu1 %v2754_v14  ;;  %v2566_v4 = vor.u32 %v3304_v58, %v2563_v59  ;;  %v3370_v58 = vld [vmem:[%s5121_s5 + $0x214] sm:$0xf0]  ;;  %v2977_v59 = vld [vmem:[%s5121_s5 + $0x348] sm:$0xf] }
  0xd9   :  { %1672 = vmatmul.bf16.vlgmr.msra.gmra.mxu1 %v4632_v50 }
  0xda   :  { %1757 = vmatpush.bf16.msra.mxu0 %v2646_v13  ;;  %1720 = vmatpush.bf16.msrb.mxu1 %v2738_v22  ;;  %v2771_v13 = vld [vmem:[%s5121_s5 + $0x1b8] sm:$0xf0]  ;;  %v3041_v22 = vld [vmem:[%s5121_s5 + $0x3c8] sm:$0xf] }
  0xde   :  { %1758 = vmatpush.bf16.msra.mxu0 %v2630_v21  ;;  %1721 = vmatpush.bf16.msrb.mxu1 %v2722_v27  ;;  %v2774_v21 = vor.u32 %v3356_v11, %v2771_v13  ;;  %v3042_v27 = vor.u32 %v3426_v23, %v3041_v22  ;;  %v2945_v13 = vld [vmem:[%s5121_s5 + $0x308] sm:$0xf] }
  0xe0   :  { %v770_v33 = vpop.f32.mrf.mxu0 }
  0xe1   :  { %v783_v35 = vpop.f32.mrf.mxu1  ;;  %v771_v39 = vadd.f32 %v770_v33, %v758_v32  ;;  %v3422_v32 = vld [vmem:[%s5121_s5 + $0x3b4] sm:$0xf0]  ;;  %v2739_v33 = vld [vmem:[%s5121_s5 + $0x178] sm:$0xf0] }
  0xe2   :  { %1759 = vmatpush.bf16.msra.mxu0 %v2614_v26  ;;  %v784_v49 = vadd.f32 %v783_v35, %v161_v34  ;;  %1722 = vmatpush.bf16.msrb.mxu1 %v2706_v40  ;;  %v2882_v26 = vor.u32 %v3386_v19, %v2881_v18  ;;  %v2866_v34 = vor.u32 %v3382_v29, %v2865_v28  ;;  %v3009_v40 = vld [vmem:[%s5121_s5 + $0x388] sm:$0xf]  ;;  %v3428_v18 = vld [vmem:[%s5121_s5 + $0x3ec] sm:$0xf]  ;;  %v3059_v19 = vld [vmem:[%s5121_s5 + $0x3f8] sm:$0xf0] }
  0xe3   :  { %v815_v45 = vmax.f32 %v771_v39, 0.0  ;;  %v3026_v35 = vor.u32 %v3422_v32, %v3025_v31  ;;  %v3010_v44 = vor.u32 %v3418_v41, %v3009_v40  ;;  %v3062_v23 = vor.u32 %v3428_v18, %v3059_v19  ;;  %v2867_v28 = vld [vmem:[%s5121_s5 + $0x278] sm:$0xf0]  ;;  %v3420_v29 = vld [vmem:[%s5121_s5 + $0x3ac] sm:$0xf]  ;;  %v3441_v18 = vld [vmem:[%s5123_s7 + $0x50] sm:$0xff] }
  0xe4   :  { %v2835_v40 = vld [vmem:[%s5121_s5 + $0x238] sm:$0xf0]  ;;  %v3412_v41 = vld [vmem:[%s5121_s5 + $0x36c] sm:$0xf]  ;;  %v3453_v19 = vld [vmem:[%s5123_s7 + $0xb0] sm:$0xff] }
  0xe5   :  { %v4735_v53 = vpack.c.bf16 %v815_v45, %v815_v45  ;;  %v2833_v45 = vld [vmem:[%s5121_s5 + $0x228] sm:$0xf] }
  0xe6   :  { %1760 = vmatpush.bf16.msra.mxu0 %v2598_v36  ;;  %1723 = vmatpush.bf16.msrb.mxu1 %v2690_v54  ;;  %v2849_v36 = vld [vmem:[%s5121_s5 + $0x248] sm:$0xf]  ;;  %v2707_v54 = vld [vmem:[%s5121_s5 + $0x138] sm:$0xf0]  ;;  %v2834_v55 = vor.u32 %v3374_v46, %v2833_v45  ;;  %v3408_v46 = vld [vmem:[%s5121_s5 + $0x34c] sm:$0xf] }
  0xe7   :  { %1633 = vmatmul.bf16.vlgmr.msrb.gmra.mxu2 %v4735_v53  ;;  %v2850_v43 = vor.u32 %v3378_v37, %v2849_v36  ;;  %v2819_v45 = vld [vmem:[%s5121_s5 + $0x218] sm:$0xf0] }
  0xe8   :  { %v796_v60 = vpop.f32.mrf.mxu2  ;;  %1729 = vmatpush.bf16.msrb.mxu2 %v2930_v51  ;;  %v772_v1 = vpop.f32.mrf.mxu0  ;;  %v3414_v51 = vld [vmem:[%s5121_s5 + $0x374] sm:$0xf0] }
  0xe9   :  { %v809_v61 = vpop.f32.mrf.mxu3  ;;  %v797_v0 = vadd.f32 %v796_v60, %v784_v49  ;;  %v785_v2 = vpop.f32.mrf.mxu1  ;;  %1724 = vmatmul.bf16.vlgmr.msrb.gmra.mxu1 %v4632_v50  ;;  %v2993_v49 = vld [vmem:[%s5121_s5 + $0x368] sm:$0xf]  ;;  %v2691_v1 = vld [vmem:[%s5121_s5 + $0x118] sm:$0xf0] }
  0xea   :  { %1761 = vmatpush.bf16.msra.mxu0 %v2582_v52  ;;  %1768 = vmatpush.bf16.msra.mxu1 %v2806_v57  ;;  %v3340_v52 = vld [vmem:[%s5121_s5 + $0x12c] sm:$0xf]  ;;  %v2994_v56 = vor.u32 %v3414_v51, %v2993_v49  ;;  %v2817_v57 = vld [vmem:[%s5121_s5 + $0x208] sm:$0xf] }
  0xeb   :  { %v810_v7 = vadd.f32 %v809_v61, %v797_v0  ;;  %v2710_v60 = vor.u32 %v3340_v52, %v2707_v54  ;;  %v3410_v61 = vld [vmem:[%s5121_s5 + $0x354] sm:$0xf0]  ;;  %v3336_v0 = vld [vmem:[%s5121_s5 + $0x10c] sm:$0xf]  ;;  %v2818_v2 = vor.u32 %v3370_v58, %v2817_v57  ;;  %v2963_v54 = vld [vmem:[%s5121_s5 + $0x338] sm:$0xf0] }
  0xec   :  { %1730 = vmatpush.bf16.msrb.mxu2 %v2914_v3  ;;  %v2978_v3 = vor.u32 %v3410_v61, %v2977_v59  ;;  %v2694_v5 = vor.u32 %v3336_v0, %v2691_v1  ;;  %v3404_v52 = vld [vmem:[%s5121_s5 + $0x32c] sm:$0xf]  ;;  %v2947_v57 = vld [vmem:[%s5121_s5 + $0x318] sm:$0xf0] }
  0xed   :  { %v816_v14 = vmax.f32 %v810_v7, 0.0  ;;  %v3406_v7 = vld [vmem:[%s5121_s5 + $0x334] sm:$0xf0] }
  0xee   :  { %1762 = vmatpush.bf16.msra.mxu0 %v2566_v4  ;;  %1769 = vmatpush.bf16.msra.mxu1 %v2790_v8  ;;  %v2934_v4 = vor.u32 %v3396_v62, %v2931_v63  ;;  %v3392_v8 = vld [vmem:[%s5121_s5 + $0x2cc] sm:$0xf]  ;;  %v2962_v10 = vor.u32 %v3406_v7, %v2961_v6  ;;  %v3438_v61 = vld [vmem:[%s5123_s7 + $0x38] sm:$0xff]  ;;  %v3437_v62 = vld [vmem:[%s5123_s7 + $0x30] sm:$0xff] }
  0xef   :  { %v4781_v17 = vpack.c.bf16 %v816_v14, %v816_v14  ;;  %v2918_v11 = vor.u32 %v3392_v8, %v2915_v9  ;;  %v3402_v14 = vld [vmem:[%s5121_s5 + $0x314] sm:$0xf0]  ;;  %v3432_v8 = vld [vmem:[%s5123_s7 + $0x8] sm:$0xff] }
  0xf0   :  { %v798_v12 = vpop.f32.mrf.mxu2  ;;  %1731 = vmatpush.bf16.msrb.mxu2 %v2898_v15  ;;  %v3388_v15 = vld [vmem:[%s5121_s5 + $0x2ac] sm:$0xf] }
  0xf1   :  { %v811_v20 = vpop.f32.mrf.mxu3  ;;  %1646 = vmatmul.bf16.vlgmr.msrb.gmra.mxu3 %v4781_v17  ;;  %1763 = vmatmul.bf16.vlgmr.msra.gmra.mxu0 %v4498_v38  ;;  %v3348_v38 = vld [vmem:[%s5121_s5 + $0x16c] sm:$0xf] }
  0xf2   :  { %1742 = vmatpush.bf16.msrb.mxu3 %v3058_v16  ;;  %1770 = vmatpush.bf16.msra.mxu1 %v2774_v21  ;;  %v2742_v39 = vor.u32 %v3348_v38, %v2739_v33  ;;  %v2899_v16 = vld [vmem:[%s5121_s5 + $0x2b8] sm:$0xf0]  ;;  %v2946_v21 = vor.u32 %v3402_v14, %v2945_v13  ;;  %v3384_v12 = vld [vmem:[%s5121_s5 + $0x28c] sm:$0xf] }
  0xf3   :  { %v2902_v22 = vor.u32 %v3388_v15, %v2899_v16  ;;  %v2883_v20 = vld [vmem:[%s5121_s5 + $0x298] sm:$0xf0]  ;;  %v3376_v38 = vld [vmem:[%s5121_s5 + $0x24c] sm:$0xf]  ;;  %2095 = vmatpush.bf16.msrb.mxu0 %v3438_v61 }
  0xf4   :  { %1732 = vmatpush.bf16.msrb.mxu2 %v2882_v26  ;;  %v2886_v25 = vor.u32 %v3384_v12, %v2883_v20  ;;  %v2851_v33 = vld [vmem:[%s5121_s5 + $0x258] sm:$0xf0]  ;;  %v3444_v9 = vld [vmem:[%s5123_s7 + $0x68] sm:$0xff]  ;;  %v5045_v12 = vld [vmem:[%s5122_s6] sm:$0xf] }
  0xf5   :  { %v2854_v36 = vor.u32 %v3376_v38, %v2851_v33  ;;  %v3442_v15 = vld [vmem:[%s5123_s7 + $0x58] sm:$0xff]  ;;  %v3439_v20 = vld [vmem:[%s5123_s7 + $0x40] sm:$0xff] }
  0xf6   :  { %1743 = vmatpush.bf16.msrb.mxu3 %v3042_v27  ;;  %1771 = vmatpush.bf16.msra.mxu1 %v2758_v30  ;;  %v3380_v27 = vld [vmem:[%s5121_s5 + $0x26c] sm:$0xf]  ;;  %v3027_v30 = vld [vmem:[%s5121_s5 + $0x3b8] sm:$0xf0] }
  0xf7   :  { %1685 = vmatmul.bf16.vlgmr.msra.gmra.mxu2 %v4735_v53  ;;  %v2870_v31 = vor.u32 %v3380_v27, %v2867_v28  ;;  %v3030_v32 = vor.u32 %v3420_v29, %v3027_v30  ;;  %2096 = vmatpush.bf16.msrb.mxu0 %v3437_v62  ;;  %v3454_v16 = vld [vmem:[%s5123_s7 + $0xb8] sm:$0xff]  ;;  %v1807_v29 = vld [vmem:[%s5118_s2] sm:$0xff] }
  0xf8   :  { %1733 = vmatpush.bf16.msrb.mxu2 %v2866_v34  ;;  %v3416_v34 = vld [vmem:[%s5121_s5 + $0x38c] sm:$0xf]  ;;  %v3450_v27 = vld [vmem:[%s5123_s7 + $0x98] sm:$0xff]  ;;  %v3063_v38 = vxor.u32 2147483648, %v1807_v29 }
  0xfa   :  { %1744 = vmatpush.bf16.msrb.mxu3 %v3026_v35  ;;  %1772 = vmatpush.bf16.msra.mxu1 %v2742_v39  ;;  %v3011_v35 = vld [vmem:[%s5121_s5 + $0x398] sm:$0xf0]  ;;  %v3372_v39 = vld [vmem:[%s5121_s5 + $0x22c] sm:$0xf]  ;;  %vm1813_vm5 = vcmp.ge.s32.totalorder %v3063_v38, 1073741824 }
  0xfb   :  { %v3014_v37 = vor.u32 %v3416_v34, %v3011_v35  ;;  %v2838_v48 = vor.u32 %v3372_v39, %v2835_v40  ;;  %vm3195_vm6 = vmpackc.low %vm1813_vm5, %vm1813_vm5 }
  0xfc   :  { %1734 = vmatpush.bf16.msrb.mxu2 %v2850_v43  ;;  %v2998_v43 = vor.u32 %v3412_v41, %v2995_v42  ;;  %v3447_v42 = vld [vmem:[%s5123_s7 + $0x80] sm:$0xff] }
  0xfe   :  { %1745 = vmatpush.bf16.msrb.mxu3 %v3010_v44  ;;  %1773 = vmatpush.bf16.msra.mxu1 %v2726_v47  ;;  %v3368_v44 = vld [vmem:[%s5121_s5 + $0x20c] sm:$0xf]  ;;  %v2979_v47 = vld [vmem:[%s5121_s5 + $0x358] sm:$0xf0] }
  0xff   :  { %v2822_v49 = vor.u32 %v3368_v44, %v2819_v45  ;;  %v2982_v51 = vor.u32 %v3408_v46, %v2979_v47  ;;  %v952_v44 = vperm.slane %v5045_v12, 1  ;;  %v3461_v46 = vld [vmem:[%s5123_s7 + $0xf0] sm:$0xff] }
 0x100   :  { %1735 = vmatpush.bf16.msrb.mxu2 %v2834_v55  ;;  %v2966_v55 = vor.u32 %v3404_v52, %v2963_v54 }
 0x101   :  { %1698 = vmatmul.bf16.vlgmr.msra.gmra.mxu3 %v4781_v17 }
 0x102   :  { %1746 = vmatpush.bf16.msrb.mxu3 %v2994_v56  ;;  %1774 = vmatpush.bf16.msra.mxu1 %v2710_v60  ;;  %v3400_v56 = vld [vmem:[%s5121_s5 + $0x30c] sm:$0xf] }
 0x103   :  { %v2950_v58 = vor.u32 %v3400_v56, %v2947_v57  ;;  %v3459_v56 = vld [vmem:[%s5123_s7 + $0xe0] sm:$0xff] }
 0x104   :  { %1736 = vmatpush.bf16.msrb.mxu2 %v2818_v2  ;;  %v3434_v2 = vld [vmem:[%s5123_s7 + $0x18] sm:$0xff] }
 0x106   :  { %1747 = vmatpush.bf16.msrb.mxu3 %v2978_v3  ;;  %1775 = vmatpush.bf16.msra.mxu1 %v2694_v5  ;;  %v3446_v3 = vld [vmem:[%s5123_s7 + $0x78] sm:$0xff]  ;;  %v3445_v5 = vld [vmem:[%s5123_s7 + $0x70] sm:$0xff] }
 0x107   :  { %1737 = vmatmul.bf16.vlgmr.msrb.gmra.mxu2 %v4735_v53 }
 0x108   :  { %1781 = vmatpush.bf16.msra.mxu2 %v2934_v4  ;;  %v3433_v4 = vld [vmem:[%s5123_s7 + $0x10] sm:$0xff] }
 0x109   :  { %1776 = vmatmul.bf16.vlgmr.msra.gmra.mxu1 %v4632_v50  ;;  %v3043_v50 = vld [vmem:[%s5121_s5 + $0x3d8] sm:$0xf0] }
 0x10a   :  { %1748 = vmatpush.bf16.msrb.mxu3 %v2962_v10  ;;  %v3046_v26 = vor.u32 %v3424_v24, %v3043_v50  ;;  %2108 = vmatpush.bf16.msrb.mxu1 %v3446_v3  ;;  %v3431_v10 = vld [vmem:[%s5123_s7] sm:$0xff]  ;;  %v951_v50 = vperm.slane %v5045_v12, 0  ;;  %v1809_v3 = vld [vmem:[%s5118_s2 + $0x10] sm:$0xff] }
 0x10b   :  { %v3451_v24 = vld [vmem:[%s5123_s7 + $0xa0] sm:$0xff] }
 0x10c   :  { %1782 = vmatpush.bf16.msra.mxu2 %v2918_v11  ;;  %v3443_v11 = vld [vmem:[%s5123_s7 + $0x60] sm:$0xff] }
 0x10e   :  { %1749 = vmatpush.bf16.msrb.mxu3 %v2946_v21  ;;  %2109 = vmatpush.bf16.msrb.mxu1 %v3445_v5 }
 0x110   :  { %1783 = vmatpush.bf16.msra.mxu2 %v2902_v22  ;;  %v3440_v22 = vld [vmem:[%s5123_s7 + $0x48] sm:$0xff] }
 0x111   :  { %1750 = vmatmul.bf16.vlgmr.msrb.gmra.mxu3 %v4781_v17 }
 0x112   :  { %1794 = vmatpush.bf16.msra.mxu3 %v3062_v23  ;;  %2110 = vmatpush.bf16.msrb.mxu1 %v3444_v9  ;;  %v3452_v23 = vld [vmem:[%s5123_s7 + $0xa8] sm:$0xff]  ;;  %v3065_v9 = vxor.u32 2147483648, %v1809_v3 }
 0x114   :  { %1784 = vmatpush.bf16.msra.mxu2 %v2886_v25  ;;  %vm1819_vm9 = vcmp.ge.s32.totalorder %v3065_v9, 1073741824 }
 0x115   :  { %vm3201_vm10 = vmpackc.low %vm1819_vm9, %vm1819_vm9 }
 0x116   :  { %1795 = vmatpush.bf16.msra.mxu3 %v3046_v26  ;;  %2111 = vmatpush.bf16.msrb.mxu1 %v3443_v11 }
 0x118   :  { %1785 = vmatpush.bf16.msra.mxu2 %v2870_v31  ;;  %v3449_v31 = vld [vmem:[%s5123_s7 + $0x90] sm:$0xff] }
 0x11a   :  { %1796 = vmatpush.bf16.msra.mxu3 %v3030_v32  ;;  %2112 = vmatpush.bf16.msrb.mxu1 %v3442_v15 }
 0x11c   :  { %1786 = vmatpush.bf16.msra.mxu2 %v2854_v36  ;;  %v3448_v36 = vld [vmem:[%s5123_s7 + $0x88] sm:$0xff] }
 0x11e   :  { %1797 = vmatpush.bf16.msra.mxu3 %v3014_v37  ;;  %2113 = vmatpush.bf16.msrb.mxu1 %v3441_v18 }
 0x120   :  { %1787 = vmatpush.bf16.msra.mxu2 %v2838_v48  ;;  %v3462_v48 = vld [vmem:[%s5123_s7 + $0xf8] sm:$0xff] }
 0x122   :  { %1798 = vmatpush.bf16.msra.mxu3 %v2998_v43  ;;  %2114 = vmatpush.bf16.msrb.mxu1 %v3440_v22  ;;  %v1810_v22 = vld [vmem:[%s5118_s2 + $0x18] sm:$0xff] }
 0x124   :  { %1788 = vmatpush.bf16.msra.mxu2 %v2822_v49  ;;  %v3460_v49 = vld [vmem:[%s5123_s7 + $0xe8] sm:$0xff] }
 0x126   :  { %1799 = vmatpush.bf16.msra.mxu3 %v2982_v51  ;;  %2115 = vmatpush.bf16.msrb.mxu1 %v3439_v20  ;;  %v1808_v51 = vld [vmem:[%s5118_s2 + $0x8] sm:$0xff] }
 0x127   :  { %1789 = vmatmul.bf16.vlgmr.msra.gmra.mxu2 %v4735_v53  ;;  %v3436_v53 = vld [vmem:[%s5123_s7 + $0x28] sm:$0xff] }
 0x128   :  { %2097 = vmatpush.bf16.msrb.mxu0 %v3436_v53  ;;  %2121 = vmatpush.bf16.msrb.mxu2 %v3454_v16  ;;  %v3458_v53 = vld [vmem:[%s5123_s7 + $0xd8] sm:$0xff] }
 0x12a   :  { %1800 = vmatpush.bf16.msra.mxu3 %v2966_v55  ;;  %v3064_v55 = vxor.u32 2147483648, %v1808_v51 }
 0x12c   :  { %2122 = vmatpush.bf16.msrb.mxu2 %v3453_v19  ;;  %vm1816_vm7 = vcmp.ge.s32.totalorder %v3064_v55, 1073741824  ;;  %v954_v19 = vperm.slane %v5045_v12, 3 }
 0x12d   :  { %vm3198_vm8 = vmpackc.low %vm1816_vm7, %vm1816_vm7 }
 0x12e   :  { %1801 = vmatpush.bf16.msra.mxu3 %v2950_v58  ;;  %v1608_v59 = vpop.f32.mrf.mxu0 }
 0x12f   :  { %v1609_v28 = vadd.f32 %v1608_v59, %v951_v50 }
 0x130   :  { %2123 = vmatpush.bf16.msrb.mxu2 %v3452_v23 }
 0x131   :  { %1802 = vmatmul.bf16.vlgmr.msra.gmra.mxu3 %v4781_v17  ;;  %v3435_v17 = vld [vmem:[%s5123_s7 + $0x20] sm:$0xff] }
 0x132   :  { %2098 = vmatpush.bf16.msrb.mxu0 %v3435_v17  ;;  %2134 = vmatpush.bf16.msrb.mxu3 %v3462_v48  ;;  %v3457_v17 = vld [vmem:[%s5123_s7 + $0xd0] sm:$0xff] }
 0x134   :  { %2124 = vmatpush.bf16.msrb.mxu2 %v3451_v24  ;;  %v3066_v24 = vxor.u32 2147483648, %v1810_v22 }
 0x136   :  { %v1610_v60 = vpop.f32.mrf.mxu0  ;;  %2099 = vmatpush.bf16.msrb.mxu0 %v3434_v2  ;;  %2135 = vmatpush.bf16.msrb.mxu3 %v3461_v46  ;;  %vm1822_vm11 = vcmp.ge.s32.totalorder %v3066_v24, 1073741824 }
 0x137   :  { %vm3204_vm12 = vmpackc.low %vm1822_vm11, %vm1822_vm11 }
 0x138   :  { %2125 = vmatpush.bf16.msrb.mxu2 %v3450_v27 }
 0x13a   :  { %2100 = vmatpush.bf16.msrb.mxu0 %v3433_v4  ;;  %2136 = vmatpush.bf16.msrb.mxu3 %v3460_v49 }
 0x13c   :  { %2126 = vmatpush.bf16.msrb.mxu2 %v3449_v31 }
 0x13e   :  { %v4990_v63 = vpop.f32.mrf.mxu0  ;;  %2101 = vmatpush.bf16.msrb.mxu0 %v3432_v8  ;;  %2137 = vmatpush.bf16.msrb.mxu3 %v3459_v56 }
 0x13f   :  { %v1661_v52 = vadd.f32 %v4990_v63, %v952_v44 }
 0x140   :  { %2127 = vmatpush.bf16.msrb.mxu2 %v3448_v36 }
 0x142   :  { %2102 = vmatpush.bf16.msrb.mxu0 %v3431_v10  ;;  %2138 = vmatpush.bf16.msrb.mxu3 %v3458_v53 }
 0x144   :  { %2128 = vmatpush.bf16.msrb.mxu2 %v3447_v42 }
 0x146   :  { %v1662_v0 = vpop.f32.mrf.mxu0  ;;  %v1621_v1 = vpop.f32.mrf.mxu1  ;;  %2139 = vmatpush.bf16.msrb.mxu3 %v3457_v17 }
 0x147   :  { %v1622_v32 = vadd.f32 %v1621_v1, %v1609_v28  ;;  %v953_v0 = vperm.slane %v5045_v12, 2 }
 0x14e   :  { %v5010_v6 = vpop.f32.mrf.mxu0  ;;  %v1623_v7 = vpop.f32.mrf.mxu1 }
 0x14f   :  { %v1713_v4 = vadd.f32 %v5010_v6, %v953_v0  ;;  %v3456_v7 = vld [vmem:[%s5123_s7 + $0xc8] sm:$0xff] }
 0x150   :  { %2140 = vmatpush.bf16.msrb.mxu3 %v3456_v7 }
 0x156   :  { %v1714_v13 = vpop.f32.mrf.mxu0  ;;  %v1673_v14 = vpop.f32.mrf.mxu1 }
 0x157   :  { %v1674_v54 = vadd.f32 %v1673_v14, %v1661_v52  ;;  %v3455_v13 = vld [vmem:[%s5123_s7 + $0xc0] sm:$0xff] }
 0x158   :  { %2141 = vmatpush.bf16.msrb.mxu3 %v3455_v13 }
 0x15e   :  { %v1675_v21 = vpop.f32.mrf.mxu1 }
 0x166   :  { %v1725_v25 = vpop.f32.mrf.mxu1 }
 0x167   :  { %v1726_v8 = vadd.f32 %v1725_v25, %v1713_v4 }
 0x16a   :  { %v1634_v26 = vpop.f32.mrf.mxu2 }
 0x16b   :  { %v1635_v34 = vadd.f32 %v1634_v26, %v1622_v32 }
 0x16e   :  { %v5060_v30 = vpop.f32.mrf.mxu0  ;;  %v1727_v33 = vpop.f32.mrf.mxu1 }
 0x16f   :  { %v1765_v23 = vadd.f32 %v5060_v30, %v954_v19  ;;  %v3464_v30 = vld [vmem:[%s5124_s8] ss:$0 sm:$0xff] }
 0x172   :  { %v1636_v35 = vpop.f32.mrf.mxu2 }
 0x174   :  { %v1647_v37 = vpop.f32.mrf.mxu3 }
 0x175   :  { %v1648_v39 = vadd.f32 %v1647_v37, %v1635_v34 }
 0x176   :  { %v1766_v41 = vpop.f32.mrf.mxu0 }
 0x177   :  { %v1823_v40 = vmul.f32 4.0, %v1648_v39 }
 0x179   :  { %v3196_v43 = vpack.c.bf16 %v1823_v40, %v1823_v40 }
 0x17a   :  { %v1686_v45 = vpop.f32.mrf.mxu2 }
 0x17b   :  { %3197 = vmatmul.msk.bf16.vlgmr.msrb.gmra.mxu0 %vm3195_vm6, %v3196_v43  ;;  %v1687_v57 = vadd.f32 %v1686_v45, %v1674_v54 }
 0x17c   :  { %v1649_v47 = vpop.f32.mrf.mxu3 }
 0x182   :  { %v1688_v58 = vpop.f32.mrf.mxu2 }
 0x184   :  { %v1699_v59 = vpop.f32.mrf.mxu3 }
 0x185   :  { %v1700_v60 = vadd.f32 %v1699_v59, %v1687_v57 }
 0x186   :  { %v1777_v62 = vpop.f32.mrf.mxu1 }
 0x187   :  { %v1824_v61 = vmul.f32 4.0, %v1700_v60  ;;  %v1778_v20 = vadd.f32 %v1777_v62, %v1765_v23 }
 0x189   :  { %v3199_v63 = vpack.c.bf16 %v1824_v61, %v1824_v61 }
 0x18a   :  { %v1738_v1 = vpop.f32.mrf.mxu2 }
 0x18b   :  { %3200 = vmatmul.msk.bf16.vlgmr.msrb.gmra.mxu1 %vm3198_vm8, %v3199_v63  ;;  %v1739_v10 = vadd.f32 %v1738_v1, %v1726_v8 }
 0x18c   :  { %v1701_v2 = vpop.f32.mrf.mxu3 }
 0x18e   :  { %v1779_v5 = vpop.f32.mrf.mxu1 }
 0x192   :  { %v1740_v11 = vpop.f32.mrf.mxu2 }
 0x194   :  { %v1751_v14 = vpop.f32.mrf.mxu3 }
 0x195   :  { %v1752_v15 = vadd.f32 %v1751_v14, %v1739_v10 }
 0x197   :  { %v1825_v16 = vmul.f32 4.0, %v1752_v15 }
 0x199   :  { %v3202_v6 = vpack.c.bf16 %v1825_v16, %v1825_v16 }
 0x19b   :  { %3203 = vmatmul.msk.bf16.vlgmr.msrb.gmra.mxu2 %vm3201_vm10, %v3202_v6 }
 0x19c   :  { %v1753_v18 = vpop.f32.mrf.mxu3 }
 0x1aa   :  { %v1790_v21 = vpop.f32.mrf.mxu2 }
 0x1ab   :  { %v1791_v50 = vadd.f32 %v1790_v21, %v1778_v20 }
 0x1b2   :  { %v1792_v25 = vpop.f32.mrf.mxu2 }
 0x1b4   :  { %v1803_v26 = vpop.f32.mrf.mxu3 }
 0x1b5   :  { %v1804_v27 = vadd.f32 %v1803_v26, %v1791_v50 }
 0x1b7   :  { %v1826_v28 = vmul.f32 4.0, %v1804_v27 }
 0x1b9   :  { %v3205_v29 = vpack.c.bf16 %v1826_v28, %v1826_v28 }
 0x1bb   :  { %3206 = vmatmul.msk.bf16.vlgmr.msrb.gmra.mxu3 %vm3204_vm12, %v3205_v29 }
 0x1bc   :  { %v1805_v31 = vpop.f32.mrf.mxu3 }
 0x1f8   :  { %v2104_v12 = vpop.f32.mrf.mxu0 }
 0x1f9   :  { %v2105_v36 = vadd.f32 %v3464_v30, %v2104_v12 }
 0x200   :  { %v2106_v32 = vpop.f32.mrf.mxu0 }
 0x208   :  { %v2117_v38 = vpop.f32.mrf.mxu1 }
 0x209   :  { %v2118_v37 = vadd.f32 %v2117_v38, %v2105_v36 }
 0x210   :  { %v2119_v33 = vpop.f32.mrf.mxu1 }
 0x21e   :  { %v2130_v34 = vpop.f32.mrf.mxu2 }
 0x21f   :  { %v2131_v39 = vadd.f32 %v2130_v34, %v2118_v37 }
 0x226   :  { %v2132_v35 = vpop.f32.mrf.mxu2 }
 0x23e   :  { %v2143_v40 = vpop.f32.mrf.mxu3 }
 0x23f   :  { %v2144_v41 = vadd.f32 %v2143_v40, %v2131_v39 }
 0x241   :  { %2147 = vst [vmem:[#allocation2] sm:$0xff] %v2144_v41 }
 0x242   :  { %2158 = dma.vmem_to_hbm [thread:$0]  %s2154_s14, 128, %s2156_s17, [#allocation3]  }
 0x246   :  { %v2145_v42 = vpop.f32.mrf.mxu3 }
 0x247   :  { %3489 = dma.done.wait [#allocation3], 128  }
 0x248   :  { %3490 = vsyncadd [#allocation3], 4294967168 }
 0x249   :  { %2163 = vsyncpa [#allocation3], 1 }

</bundles_post_ra>
